<compile_context>
chip_gen: v7x
topology: tpu7x:2x2x1
jax: 0.10.0
libtpu: 0.0.40
codegen_flags: <defaults>
</compile_context>

<pallas_src>
import jax
import jax.numpy as jnp
from jax.experimental import pallas as pl
from jax.experimental.pallas import tpu as pltpu

C_IN = 16          # Filters  (in_channels)
C_OUT = 16         # Channels (out_channels)
K = 51             # Kernel_size
DIL = 8            # Dilation
N_PHASE = 128 // DIL   # 16: taps k and k+16 share the same lane alignment
DEPTH_CHUNK = 256      # MXU contraction-depth chunk (v6e/v7x native depth)


def conv1d_im2col_kernel(x_ref, w_ref, o_ref, col_ref):
    # x_ref:   (b_blk, C_IN, W_in)       bf16
    # w_ref:   (C_OUT, K*C_IN)           bf16 (row index = k*C_IN + ci)
    # o_ref:   (b_blk, C_OUT, W_out)     f32
    # col_ref: (K*C_IN, b_blk*W_out)     bf16 VMEM scratch (im2col matrix)
    b_blk = x_ref.shape[0]
    w_out = o_ref.shape[-1]
    depth = K * C_IN

    # ---- Build the im2col matrix -------------------------------------------
    # Only N_PHASE unaligned lane slices per batch element (16*DIL == 128);
    # the per-tap sub-slices below are 128-aligned and the scratch stores land
    # on packed-sublane / lane-tile boundaries.
    for b in range(b_blk):
        xb = x_ref[b]                                        # (C_IN, W_in), bf16
        for p in range(N_PHASE):
            n_m = (K - 1 - p) // N_PHASE + 1                 # taps in this phase (3 or 4)
            width = w_out + 128 * (n_m - 1)
            xp = xb[:, p * DIL: p * DIL + width]             # one unaligned lane slice
            for m in range(n_m):
                k = p + N_PHASE * m
                col_ref[k * C_IN:(k + 1) * C_IN,
                        b * w_out:(b + 1) * w_out] = xp[:, 128 * m: 128 * m + w_out]

    # ---- One deep contraction on the MXU (chunked over depth) --------------
    acc = jnp.zeros((C_OUT, b_blk * w_out), dtype=jnp.float32)
    c0 = 0
    while c0 < depth:
        cw = min(DEPTH_CHUNK, depth - c0)
        acc = acc + jnp.dot(w_ref[:, c0:c0 + cw], col_ref[c0:c0 + cw, :],
                            preferred_element_type=jnp.float32)
        c0 += cw

    for b in range(b_blk):
        o_ref[b, :, :] = acc[:, b * w_out:(b + 1) * w_out].astype(o_ref.dtype)


def net1_forward(x, w, *, b_blk=1):
    """x: (N, C_in, W_in) f32, w: (C_out, C_in, K) f32 -> (N, C_out, W_out) f32."""
    n, c_in, w_in = x.shape
    c_out, c_in2, k = w.shape
    assert (c_in, c_in2, c_out, k) == (C_IN, C_IN, C_OUT, K)
    w_out = w_in - DIL * (K - 1)
    assert w_out > 0, "input width too small for this receptive field"
    assert n % b_blk == 0
    if b_blk > 1:
        # Keep per-batch lane slabs 128-aligned inside the shared scratch.
        assert w_out % 128 == 0, "use b_blk=1 when W_out is not a multiple of 128"

    # bf16 operands (f32 accumulation in-kernel).
    x_bf = x.astype(jnp.bfloat16)
    # Pre-flatten weight to im2col form: w2[co, k*C_in + ci] = w[co, ci, k].
    w_bf = jnp.transpose(w.astype(jnp.bfloat16), (0, 2, 1)).reshape(C_OUT, K * C_IN)

    return pl.pallas_call(
        conv1d_im2col_kernel,
        out_shape=jax.ShapeDtypeStruct((n, c_out, w_out), x.dtype),
        grid_spec=pltpu.PrefetchScalarGridSpec(
            num_scalar_prefetch=0,
            grid=(n // b_blk,),
            in_specs=[
                pl.BlockSpec((b_blk, C_IN, w_in), lambda g: (g, 0, 0)),
                pl.BlockSpec((C_OUT, K * C_IN), lambda g: (0, 0)),
            ],
            out_specs=pl.BlockSpec((b_blk, C_OUT, w_out), lambda g: (g, 0, 0)),
            scratch_shapes=[pltpu.VMEM((K * C_IN, b_blk * w_out), jnp.bfloat16)],
        ),
        compiler_params=pltpu.CompilerParams(
            dimension_semantics=("parallel",)),
    )(x_bf, w_bf)


if __name__ == "__main__":
    key = jax.random.PRNGKey(0)
    kx, kw = jax.random.split(key)

    batch = 4
    # Receptive field = dilation*(K-1)+1 = 401; pick W_in so W_out = 128 (lane-dense).
    w_in = DIL * (K - 1) + 128   # 528

    x = jax.random.normal(kx, (batch, C_IN, w_in), dtype=jnp.float32)
    bound = 1.0 / (C_IN * K) ** 0.5
    w = jax.random.uniform(kw, (C_OUT, C_IN, K),
                           dtype=jnp.float32, minval=-bound, maxval=bound)

    out = net1_forward(x, w, b_blk=2)   # 2 batch elements folded per grid step
    out = jax.block_until_ready(out)

    # Reference with the same bf16 operand rounding (f32 accumulation).
    ref = jax.lax.conv_general_dilated(
        x.astype(jnp.bfloat16).astype(jnp.float32),
        w.astype(jnp.bfloat16).astype(jnp.float32),
        window_strides=(1,), padding="VALID",
        rhs_dilation=(DIL,),
        dimension_numbers=("NCH", "OIH", "NCH"))

    assert out.shape == ref.shape == (batch, C_OUT, 128)
    assert jnp.allclose(out, ref, atol=5e-3, rtol=5e-3), \
        float(jnp.max(jnp.abs(out - ref)))

    print("KERNEL_OK")
</pallas_src>

<mosaic_0001>
module attributes {stable_mosaic.version = 11 : i64} {
  func.func @conv1d_im2col_kernel(%arg0: i32, %arg1: memref<2x16x528xbf16, #tpu.memory_space<vmem>>, %arg2: memref<16x816xbf16, #tpu.memory_space<vmem>>, %arg3: memref<2x16x128xf32, #tpu.memory_space<vmem>>, %arg4: memref<816x256xbf16, #tpu.memory_space<vmem>>) attributes {dimension_semantics = [#tpu.dimension_semantics<parallel>], iteration_bounds = array<i64: 2>, scalar_prefetch = 0 : i64, scratch_operands = 1 : i64, tpu.core_type = #tpu.core_type<tc>, window_params = [{transform_indices = @transform_0, window_bounds = array<i64: 2, 16, 528>}, {pipeline_mode = #tpu.pipeline_mode<synchronous>, transform_indices = @transform_1, window_bounds = array<i64: 16, 816>}, {transform_indices = @transform_2, window_bounds = array<i64: 2, 16, 128>}]} {
    %c0 = arith.constant 0 : index
    %c0_0 = arith.constant 0 : index
    %c0_1 = arith.constant 0 : index
    %0 = vector.load %arg1[%c0, %c0_0, %c0_1] : memref<2x16x528xbf16, #tpu.memory_space<vmem>>, vector<1x16x528xbf16>
    %1 = vector.shape_cast %0 : vector<1x16x528xbf16> to vector<16x528xbf16>
    %2 = vector.extract_strided_slice %1 {offsets = [0, 0], sizes = [16, 512], strides = [1, 1]} : vector<16x528xbf16> to vector<16x512xbf16>
    %3 = vector.extract_strided_slice %2 {offsets = [0, 0], sizes = [16, 128], strides = [1, 1]} : vector<16x512xbf16> to vector<16x128xbf16>
    %c0_2 = arith.constant 0 : index
    %c0_3 = arith.constant 0 : index
    %4 = vector.load %arg4[%c0_2, %c0_3] : memref<816x256xbf16, #tpu.memory_space<vmem>>, vector<16x128xbf16>
    tpu.vector_store %arg4[%c0_2, %c0_3], %3 {strides = array<i32>} : memref<816x256xbf16, #tpu.memory_space<vmem>>, vector<16x128xbf16>,
    %5 = vector.extract_strided_slice %2 {offsets = [0, 128], sizes = [16, 128], strides = [1, 1]} : vector<16x512xbf16> to vector<16x128xbf16>
    %c256 = arith.constant 256 : index
    %c0_4 = arith.constant 0 : index
    %6 = vector.load %arg4[%c256, %c0_4] : memref<816x256xbf16, #tpu.memory_space<vmem>>, vector<16x128xbf16>
    tpu.vector_store %arg4[%c256, %c0_4], %5 {strides = array<i32>} : memref<816x256xbf16, #tpu.memory_space<vmem>>, vector<16x128xbf16>,
    %7 = vector.extract_strided_slice %2 {offsets = [0, 256], sizes = [16, 128], strides = [1, 1]} : vector<16x512xbf16> to vector<16x128xbf16>
    %c512 = arith.constant 512 : index
    %c0_5 = arith.constant 0 : index
    %8 = vector.load %arg4[%c512, %c0_5] : memref<816x256xbf16, #tpu.memory_space<vmem>>, vector<16x128xbf16>
    tpu.vector_store %arg4[%c512, %c0_5], %7 {strides = array<i32>} : memref<816x256xbf16, #tpu.memory_space<vmem>>, vector<16x128xbf16>,
    %9 = vector.extract_strided_slice %2 {offsets = [0, 384], sizes = [16, 128], strides = [1, 1]} : vector<16x512xbf16> to vector<16x128xbf16>
    %c768 = arith.constant 768 : index
    %c0_6 = arith.constant 0 : index
    %10 = vector.load %arg4[%c768, %c0_6] : memref<816x256xbf16, #tpu.memory_space<vmem>>, vector<16x128xbf16>
    tpu.vector_store %arg4[%c768, %c0_6], %9 {strides = array<i32>} : memref<816x256xbf16, #tpu.memory_space<vmem>>, vector<16x128xbf16>,
    %11 = vector.extract_strided_slice %1 {offsets = [0, 8], sizes = [16, 512], strides = [1, 1]} : vector<16x528xbf16> to vector<16x512xbf16>
    %12 = vector.extract_strided_slice %11 {offsets = [0, 0], sizes = [16, 128], strides = [1, 1]} : vector<16x512xbf16> to vector<16x128xbf16>
    %c16 = arith.constant 16 : index
    %c0_7 = arith.constant 0 : index
    %13 = vector.load %arg4[%c16, %c0_7] : memref<816x256xbf16, #tpu.memory_space<vmem>>, vector<16x128xbf16>
    tpu.vector_store %arg4[%c16, %c0_7], %12 {strides = array<i32>} : memref<816x256xbf16, #tpu.memory_space<vmem>>, vector<16x128xbf16>,
    %14 = vector.extract_strided_slice %11 {offsets = [0, 128], sizes = [16, 128], strides = [1, 1]} : vector<16x512xbf16> to vector<16x128xbf16>
    %c272 = arith.constant 272 : index
    %c0_8 = arith.constant 0 : index
    %15 = vector.load %arg4[%c272, %c0_8] : memref<816x256xbf16, #tpu.memory_space<vmem>>, vector<16x128xbf16>
    tpu.vector_store %arg4[%c272, %c0_8], %14 {strides = array<i32>} : memref<816x256xbf16, #tpu.memory_space<vmem>>, vector<16x128xbf16>,
    %16 = vector.extract_strided_slice %11 {offsets = [0, 256], sizes = [16, 128], strides = [1, 1]} : vector<16x512xbf16> to vector<16x128xbf16>
    %c528 = arith.constant 528 : index
    %c0_9 = arith.constant 0 : index
    %17 = vector.load %arg4[%c528, %c0_9] : memref<816x256xbf16, #tpu.memory_space<vmem>>, vector<16x128xbf16>
    tpu.vector_store %arg4[%c528, %c0_9], %16 {strides = array<i32>} : memref<816x256xbf16, #tpu.memory_space<vmem>>, vector<16x128xbf16>,
    %18 = vector.extract_strided_slice %11 {offsets = [0, 384], sizes = [16, 128], strides = [1, 1]} : vector<16x512xbf16> to vector<16x128xbf16>
    %c784 = arith.constant 784 : index
    %c0_10 = arith.constant 0 : index
    %19 = vector.load %arg4[%c784, %c0_10] : memref<816x256xbf16, #tpu.memory_space<vmem>>, vector<16x128xbf16>
    tpu.vector_store %arg4[%c784, %c0_10], %18 {strides = array<i32>} : memref<816x256xbf16, #tpu.memory_space<vmem>>, vector<16x128xbf16>,
    %20 = vector.extract_strided_slice %1 {offsets = [0, 16], sizes = [16, 512], strides = [1, 1]} : vector<16x528xbf16> to vector<16x512xbf16>
    %21 = vector.extract_strided_slice %20 {offsets = [0, 0], sizes = [16, 128], strides = [1, 1]} : vector<16x512xbf16> to vector<16x128xbf16>
    %c32 = arith.constant 32 : index
    %c0_11 = arith.constant 0 : index
    %22 = vector.load %arg4[%c32, %c0_11] : memref<816x256xbf16, #tpu.memory_space<vmem>>, vector<16x128xbf16>
    tpu.vector_store %arg4[%c32, %c0_11], %21 {strides = array<i32>} : memref<816x256xbf16, #tpu.memory_space<vmem>>, vector<16x128xbf16>,
    %23 = vector.extract_strided_slice %20 {offsets = [0, 128], sizes = [16, 128], strides = [1, 1]} : vector<16x512xbf16> to vector<16x128xbf16>
    %c288 = arith.constant 288 : index
    %c0_12 = arith.constant 0 : index
    %24 = vector.load %arg4[%c288, %c0_12] : memref<816x256xbf16, #tpu.memory_space<vmem>>, vector<16x128xbf16>
    tpu.vector_store %arg4[%c288, %c0_12], %23 {strides = array<i32>} : memref<816x256xbf16, #tpu.memory_space<vmem>>, vector<16x128xbf16>,
    %25 = vector.extract_strided_slice %20 {offsets = [0, 256], sizes = [16, 128], strides = [1, 1]} : vector<16x512xbf16> to vector<16x128xbf16>
    %c544 = arith.constant 544 : index
    %c0_13 = arith.constant 0 : index
    %26 = vector.load %arg4[%c544, %c0_13] : memref<816x256xbf16, #tpu.memory_space<vmem>>, vector<16x128xbf16>
    tpu.vector_store %arg4[%c544, %c0_13], %25 {strides = array<i32>} : memref<816x256xbf16, #tpu.memory_space<vmem>>, vector<16x128xbf16>,
    %27 = vector.extract_strided_slice %20 {offsets = [0, 384], sizes = [16, 128], strides = [1, 1]} : vector<16x512xbf16> to vector<16x128xbf16>
    %c800 = arith.constant 800 : index
    %c0_14 = arith.constant 0 : index
    %28 = vector.load %arg4[%c800, %c0_14] : memref<816x256xbf16, #tpu.memory_space<vmem>>, vector<16x128xbf16>
    tpu.vector_store %arg4[%c800, %c0_14], %27 {strides = array<i32>} : memref<816x256xbf16, #tpu.memory_space<vmem>>, vector<16x128xbf16>,
    %29 = vector.extract_strided_slice %1 {offsets = [0, 24], sizes = [16, 384], strides = [1, 1]} : vector<16x528xbf16> to vector<16x384xbf16>
    %30 = vector.extract_strided_slice %29 {offsets = [0, 0], sizes = [16, 128], strides = [1, 1]} : vector<16x384xbf16> to vector<16x128xbf16>
    %c48 = arith.constant 48 : index
    %c0_15 = arith.constant 0 : index
    %31 = vector.load %arg4[%c48, %c0_15] : memref<816x256xbf16, #tpu.memory_space<vmem>>, vector<16x128xbf16>
    tpu.vector_store %arg4[%c48, %c0_15], %30 {strides = array<i32>} : memref<816x256xbf16, #tpu.memory_space<vmem>>, vector<16x128xbf16>,
    %32 = vector.extract_strided_slice %29 {offsets = [0, 128], sizes = [16, 128], strides = [1, 1]} : vector<16x384xbf16> to vector<16x128xbf16>
    %c304 = arith.constant 304 : index
    %c0_16 = arith.constant 0 : index
    %33 = vector.load %arg4[%c304, %c0_16] : memref<816x256xbf16, #tpu.memory_space<vmem>>, vector<16x128xbf16>
    tpu.vector_store %arg4[%c304, %c0_16], %32 {strides = array<i32>} : memref<816x256xbf16, #tpu.memory_space<vmem>>, vector<16x128xbf16>,
    %34 = vector.extract_strided_slice %29 {offsets = [0, 256], sizes = [16, 128], strides = [1, 1]} : vector<16x384xbf16> to vector<16x128xbf16>
    %c560 = arith.constant 560 : index
    %c0_17 = arith.constant 0 : index
    %35 = vector.load %arg4[%c560, %c0_17] : memref<816x256xbf16, #tpu.memory_space<vmem>>, vector<16x128xbf16>
    tpu.vector_store %arg4[%c560, %c0_17], %34 {strides = array<i32>} : memref<816x256xbf16, #tpu.memory_space<vmem>>, vector<16x128xbf16>,
    %36 = vector.extract_strided_slice %1 {offsets = [0, 32], sizes = [16, 384], strides = [1, 1]} : vector<16x528xbf16> to vector<16x384xbf16>
    %37 = vector.extract_strided_slice %36 {offsets = [0, 0], sizes = [16, 128], strides = [1, 1]} : vector<16x384xbf16> to vector<16x128xbf16>
    %c64 = arith.constant 64 : index
    %c0_18 = arith.constant 0 : index
    %38 = vector.load %arg4[%c64, %c0_18] : memref<816x256xbf16, #tpu.memory_space<vmem>>, vector<16x128xbf16>
    tpu.vector_store %arg4[%c64, %c0_18], %37 {strides = array<i32>} : memref<816x256xbf16, #tpu.memory_space<vmem>>, vector<16x128xbf16>,
    %39 = vector.extract_strided_slice %36 {offsets = [0, 128], sizes = [16, 128], strides = [1, 1]} : vector<16x384xbf16> to vector<16x128xbf16>
    %c320 = arith.constant 320 : index
    %c0_19 = arith.constant 0 : index
    %40 = vector.load %arg4[%c320, %c0_19] : memref<816x256xbf16, #tpu.memory_space<vmem>>, vector<16x128xbf16>
    tpu.vector_store %arg4[%c320, %c0_19], %39 {strides = array<i32>} : memref<816x256xbf16, #tpu.memory_space<vmem>>, vector<16x128xbf16>,
    %41 = vector.extract_strided_slice %36 {offsets = [0, 256], sizes = [16, 128], strides = [1, 1]} : vector<16x384xbf16> to vector<16x128xbf16>
    %c576 = arith.constant 576 : index
    %c0_20 = arith.constant 0 : index
    %42 = vector.load %arg4[%c576, %c0_20] : memref<816x256xbf16, #tpu.memory_space<vmem>>, vector<16x128xbf16>
    tpu.vector_store %arg4[%c576, %c0_20], %41 {strides = array<i32>} : memref<816x256xbf16, #tpu.memory_space<vmem>>, vector<16x128xbf16>,
    %43 = vector.extract_strided_slice %1 {offsets = [0, 40], sizes = [16, 384], strides = [1, 1]} : vector<16x528xbf16> to vector<16x384xbf16>
    %44 = vector.extract_strided_slice %43 {offsets = [0, 0], sizes = [16, 128], strides = [1, 1]} : vector<16x384xbf16> to vector<16x128xbf16>
    %c80 = arith.constant 80 : index
    %c0_21 = arith.constant 0 : index
    %45 = vector.load %arg4[%c80, %c0_21] : memref<816x256xbf16, #tpu.memory_space<vmem>>, vector<16x128xbf16>
    tpu.vector_store %arg4[%c80, %c0_21], %44 {strides = array<i32>} : memref<816x256xbf16, #tpu.memory_space<vmem>>, vector<16x128xbf16>,
    %46 = vector.extract_strided_slice %43 {offsets = [0, 128], sizes = [16, 128], strides = [1, 1]} : vector<16x384xbf16> to vector<16x128xbf16>
    %c336 = arith.constant 336 : index
    %c0_22 = arith.constant 0 : index
    %47 = vector.load %arg4[%c336, %c0_22] : memref<816x256xbf16, #tpu.memory_space<vmem>>, vector<16x128xbf16>
    tpu.vector_store %arg4[%c336, %c0_22], %46 {strides = array<i32>} : memref<816x256xbf16, #tpu.memory_space<vmem>>, vector<16x128xbf16>,
    %48 = vector.extract_strided_slice %43 {offsets = [0, 256], sizes = [16, 128], strides = [1, 1]} : vector<16x384xbf16> to vector<16x128xbf16>
    %c592 = arith.constant 592 : index
    %c0_23 = arith.constant 0 : index
    %49 = vector.load %arg4[%c592, %c0_23] : memref<816x256xbf16, #tpu.memory_space<vmem>>, vector<16x128xbf16>
    tpu.vector_store %arg4[%c592, %c0_23], %48 {strides = array<i32>} : memref<816x256xbf16, #tpu.memory_space<vmem>>, vector<16x128xbf16>,
    %50 = vector.extract_strided_slice %1 {offsets = [0, 48], sizes = [16, 384], strides = [1, 1]} : vector<16x528xbf16> to vector<16x384xbf16>
    %51 = vector.extract_strided_slice %50 {offsets = [0, 0], sizes = [16, 128], strides = [1, 1]} : vector<16x384xbf16> to vector<16x128xbf16>
    %c96 = arith.constant 96 : index
    %c0_24 = arith.constant 0 : index
    %52 = vector.load %arg4[%c96, %c0_24] : memref<816x256xbf16, #tpu.memory_space<vmem>>, vector<16x128xbf16>
    tpu.vector_store %arg4[%c96, %c0_24], %51 {strides = array<i32>} : memref<816x256xbf16, #tpu.memory_space<vmem>>, vector<16x128xbf16>,
    %53 = vector.extract_strided_slice %50 {offsets = [0, 128], sizes = [16, 128], strides = [1, 1]} : vector<16x384xbf16> to vector<16x128xbf16>
    %c352 = arith.constant 352 : index
    %c0_25 = arith.constant 0 : index
    %54 = vector.load %arg4[%c352, %c0_25] : memref<816x256xbf16, #tpu.memory_space<vmem>>, vector<16x128xbf16>
    tpu.vector_store %arg4[%c352, %c0_25], %53 {strides = array<i32>} : memref<816x256xbf16, #tpu.memory_space<vmem>>, vector<16x128xbf16>,
    %55 = vector.extract_strided_slice %50 {offsets = [0, 256], sizes = [16, 128], strides = [1, 1]} : vector<16x384xbf16> to vector<16x128xbf16>
    %c608 = arith.constant 608 : index
    %c0_26 = arith.constant 0 : index
    %56 = vector.load %arg4[%c608, %c0_26] : memref<816x256xbf16, #tpu.memory_space<vmem>>, vector<16x128xbf16>
    tpu.vector_store %arg4[%c608, %c0_26], %55 {strides = array<i32>} : memref<816x256xbf16, #tpu.memory_space<vmem>>, vector<16x128xbf16>,
    %57 = vector.extract_strided_slice %1 {offsets = [0, 56], sizes = [16, 384], strides = [1, 1]} : vector<16x528xbf16> to vector<16x384xbf16>
    %58 = vector.extract_strided_slice %57 {offsets = [0, 0], sizes = [16, 128], strides = [1, 1]} : vector<16x384xbf16> to vector<16x128xbf16>
    %c112 = arith.constant 112 : index
    %c0_27 = arith.constant 0 : index
    %59 = vector.load %arg4[%c112, %c0_27] : memref<816x256xbf16, #tpu.memory_space<vmem>>, vector<16x128xbf16>
    tpu.vector_store %arg4[%c112, %c0_27], %58 {strides = array<i32>} : memref<816x256xbf16, #tpu.memory_space<vmem>>, vector<16x128xbf16>,
    %60 = vector.extract_strided_slice %57 {offsets = [0, 128], sizes = [16, 128], strides = [1, 1]} : vector<16x384xbf16> to vector<16x128xbf16>
    %c368 = arith.constant 368 : index
    %c0_28 = arith.constant 0 : index
    %61 = vector.load %arg4[%c368, %c0_28] : memref<816x256xbf16, #tpu.memory_space<vmem>>, vector<16x128xbf16>
    tpu.vector_store %arg4[%c368, %c0_28], %60 {strides = array<i32>} : memref<816x256xbf16, #tpu.memory_space<vmem>>, vector<16x128xbf16>,
    %62 = vector.extract_strided_slice %57 {offsets = [0, 256], sizes = [16, 128], strides = [1, 1]} : vector<16x384xbf16> to vector<16x128xbf16>
    %c624 = arith.constant 624 : index
    %c0_29 = arith.constant 0 : index
    %63 = vector.load %arg4[%c624, %c0_29] : memref<816x256xbf16, #tpu.memory_space<vmem>>, vector<16x128xbf16>
    tpu.vector_store %arg4[%c624, %c0_29], %62 {strides = array<i32>} : memref<816x256xbf16, #tpu.memory_space<vmem>>, vector<16x128xbf16>,
    %64 = vector.extract_strided_slice %1 {offsets = [0, 64], sizes = [16, 384], strides = [1, 1]} : vector<16x528xbf16> to vector<16x384xbf16>
    %65 = vector.extract_strided_slice %64 {offsets = [0, 0], sizes = [16, 128], strides = [1, 1]} : vector<16x384xbf16> to vector<16x128xbf16>
    %c128 = arith.constant 128 : index
    %c0_30 = arith.constant 0 : index
    %66 = vector.load %arg4[%c128, %c0_30] : memref<816x256xbf16, #tpu.memory_space<vmem>>, vector<16x128xbf16>
    tpu.vector_store %arg4[%c128, %c0_30], %65 {strides = array<i32>} : memref<816x256xbf16, #tpu.memory_space<vmem>>, vector<16x128xbf16>,
    %67 = vector.extract_strided_slice %64 {offsets = [0, 128], sizes = [16, 128], strides = [1, 1]} : vector<16x384xbf16> to vector<16x128xbf16>
    %c384 = arith.constant 384 : index
    %c0_31 = arith.constant 0 : index
    %68 = vector.load %arg4[%c384, %c0_31] : memref<816x256xbf16, #tpu.memory_space<vmem>>, vector<16x128xbf16>
    tpu.vector_store %arg4[%c384, %c0_31], %67 {strides = array<i32>} : memref<816x256xbf16, #tpu.memory_space<vmem>>, vector<16x128xbf16>,
    %69 = vector.extract_strided_slice %64 {offsets = [0, 256], sizes = [16, 128], strides = [1, 1]} : vector<16x384xbf16> to vector<16x128xbf16>
    %c640 = arith.constant 640 : index
    %c0_32 = arith.constant 0 : index
    %70 = vector.load %arg4[%c640, %c0_32] : memref<816x256xbf16, #tpu.memory_space<vmem>>, vector<16x128xbf16>
    tpu.vector_store %arg4[%c640, %c0_32], %69 {strides = array<i32>} : memref<816x256xbf16, #tpu.memory_space<vmem>>, vector<16x128xbf16>,
    %71 = vector.extract_strided_slice %1 {offsets = [0, 72], sizes = [16, 384], strides = [1, 1]} : vector<16x528xbf16> to vector<16x384xbf16>
    %72 = vector.extract_strided_slice %71 {offsets = [0, 0], sizes = [16, 128], strides = [1, 1]} : vector<16x384xbf16> to vector<16x128xbf16>
    %c144 = arith.constant 144 : index
    %c0_33 = arith.constant 0 : index
    %73 = vector.load %arg4[%c144, %c0_33] : memref<816x256xbf16, #tpu.memory_space<vmem>>, vector<16x128xbf16>
    tpu.vector_store %arg4[%c144, %c0_33], %72 {strides = array<i32>} : memref<816x256xbf16, #tpu.memory_space<vmem>>, vector<16x128xbf16>,
    %74 = vector.extract_strided_slice %71 {offsets = [0, 128], sizes = [16, 128], strides = [1, 1]} : vector<16x384xbf16> to vector<16x128xbf16>
    %c400 = arith.constant 400 : index
    %c0_34 = arith.constant 0 : index
    %75 = vector.load %arg4[%c400, %c0_34] : memref<816x256xbf16, #tpu.memory_space<vmem>>, vector<16x128xbf16>
    tpu.vector_store %arg4[%c400, %c0_34], %74 {strides = array<i32>} : memref<816x256xbf16, #tpu.memory_space<vmem>>, vector<16x128xbf16>,
    %76 = vector.extract_strided_slice %71 {offsets = [0, 256], sizes = [16, 128], strides = [1, 1]} : vector<16x384xbf16> to vector<16x128xbf16>
    %c656 = arith.constant 656 : index
    %c0_35 = arith.constant 0 : index
    %77 = vector.load %arg4[%c656, %c0_35] : memref<816x256xbf16, #tpu.memory_space<vmem>>, vector<16x128xbf16>
    tpu.vector_store %arg4[%c656, %c0_35], %76 {strides = array<i32>} : memref<816x256xbf16, #tpu.memory_space<vmem>>, vector<16x128xbf16>,
    %78 = vector.extract_strided_slice %1 {offsets = [0, 80], sizes = [16, 384], strides = [1, 1]} : vector<16x528xbf16> to vector<16x384xbf16>
    %79 = vector.extract_strided_slice %78 {offsets = [0, 0], sizes = [16, 128], strides = [1, 1]} : vector<16x384xbf16> to vector<16x128xbf16>
    %c160 = arith.constant 160 : index
    %c0_36 = arith.constant 0 : index
    %80 = vector.load %arg4[%c160, %c0_36] : memref<816x256xbf16, #tpu.memory_space<vmem>>, vector<16x128xbf16>
    tpu.vector_store %arg4[%c160, %c0_36], %79 {strides = array<i32>} : memref<816x256xbf16, #tpu.memory_space<vmem>>, vector<16x128xbf16>,
    %81 = vector.extract_strided_slice %78 {offsets = [0, 128], sizes = [16, 128], strides = [1, 1]} : vector<16x384xbf16> to vector<16x128xbf16>
    %c416 = arith.constant 416 : index
    %c0_37 = arith.constant 0 : index
    %82 = vector.load %arg4[%c416, %c0_37] : memref<816x256xbf16, #tpu.memory_space<vmem>>, vector<16x128xbf16>
    tpu.vector_store %arg4[%c416, %c0_37], %81 {strides = array<i32>} : memref<816x256xbf16, #tpu.memory_space<vmem>>, vector<16x128xbf16>,
    %83 = vector.extract_strided_slice %78 {offsets = [0, 256], sizes = [16, 128], strides = [1, 1]} : vector<16x384xbf16> to vector<16x128xbf16>
    %c672 = arith.constant 672 : index
    %c0_38 = arith.constant 0 : index
    %84 = vector.load %arg4[%c672, %c0_38] : memref<816x256xbf16, #tpu.memory_space<vmem>>, vector<16x128xbf16>
    tpu.vector_store %arg4[%c672, %c0_38], %83 {strides = array<i32>} : memref<816x256xbf16, #tpu.memory_space<vmem>>, vector<16x128xbf16>,
    %85 = vector.extract_strided_slice %1 {offsets = [0, 88], sizes = [16, 384], strides = [1, 1]} : vector<16x528xbf16> to vector<16x384xbf16>
    %86 = vector.extract_strided_slice %85 {offsets = [0, 0], sizes = [16, 128], strides = [1, 1]} : vector<16x384xbf16> to vector<16x128xbf16>
    %c176 = arith.constant 176 : index
    %c0_39 = arith.constant 0 : index
    %87 = vector.load %arg4[%c176, %c0_39] : memref<816x256xbf16, #tpu.memory_space<vmem>>, vector<16x128xbf16>
    tpu.vector_store %arg4[%c176, %c0_39], %86 {strides = array<i32>} : memref<816x256xbf16, #tpu.memory_space<vmem>>, vector<16x128xbf16>,
    %88 = vector.extract_strided_slice %85 {offsets = [0, 128], sizes = [16, 128], strides = [1, 1]} : vector<16x384xbf16> to vector<16x128xbf16>
    %c432 = arith.constant 432 : index
    %c0_40 = arith.constant 0 : index
    %89 = vector.load %arg4[%c432, %c0_40] : memref<816x256xbf16, #tpu.memory_space<vmem>>, vector<16x128xbf16>
    tpu.vector_store %arg4[%c432, %c0_40], %88 {strides = array<i32>} : memref<816x256xbf16, #tpu.memory_space<vmem>>, vector<16x128xbf16>,
    %90 = vector.extract_strided_slice %85 {offsets = [0, 256], sizes = [16, 128], strides = [1, 1]} : vector<16x384xbf16> to vector<16x128xbf16>
    %c688 = arith.constant 688 : index
    %c0_41 = arith.constant 0 : index
    %91 = vector.load %arg4[%c688, %c0_41] : memref<816x256xbf16, #tpu.memory_space<vmem>>, vector<16x128xbf16>
    tpu.vector_store %arg4[%c688, %c0_41], %90 {strides = array<i32>} : memref<816x256xbf16, #tpu.memory_space<vmem>>, vector<16x128xbf16>,
    %92 = vector.extract_strided_slice %1 {offsets = [0, 96], sizes = [16, 384], strides = [1, 1]} : vector<16x528xbf16> to vector<16x384xbf16>
    %93 = vector.extract_strided_slice %92 {offsets = [0, 0], sizes = [16, 128], strides = [1, 1]} : vector<16x384xbf16> to vector<16x128xbf16>
    %c192 = arith.constant 192 : index
    %c0_42 = arith.constant 0 : index
    %94 = vector.load %arg4[%c192, %c0_42] : memref<816x256xbf16, #tpu.memory_space<vmem>>, vector<16x128xbf16>
    tpu.vector_store %arg4[%c192, %c0_42], %93 {strides = array<i32>} : memref<816x256xbf16, #tpu.memory_space<vmem>>, vector<16x128xbf16>,
    %95 = vector.extract_strided_slice %92 {offsets = [0, 128], sizes = [16, 128], strides = [1, 1]} : vector<16x384xbf16> to vector<16x128xbf16>
    %c448 = arith.constant 448 : index
    %c0_43 = arith.constant 0 : index
    %96 = vector.load %arg4[%c448, %c0_43] : memref<816x256xbf16, #tpu.memory_space<vmem>>, vector<16x128xbf16>
    tpu.vector_store %arg4[%c448, %c0_43], %95 {strides = array<i32>} : memref<816x256xbf16, #tpu.memory_space<vmem>>, vector<16x128xbf16>,
    %97 = vector.extract_strided_slice %92 {offsets = [0, 256], sizes = [16, 128], strides = [1, 1]} : vector<16x384xbf16> to vector<16x128xbf16>
    %c704 = arith.constant 704 : index
    %c0_44 = arith.constant 0 : index
    %98 = vector.load %arg4[%c704, %c0_44] : memref<816x256xbf16, #tpu.memory_space<vmem>>, vector<16x128xbf16>
    tpu.vector_store %arg4[%c704, %c0_44], %97 {strides = array<i32>} : memref<816x256xbf16, #tpu.memory_space<vmem>>, vector<16x128xbf16>,
    %99 = vector.extract_strided_slice %1 {offsets = [0, 104], sizes = [16, 384], strides = [1, 1]} : vector<16x528xbf16> to vector<16x384xbf16>
    %100 = vector.extract_strided_slice %99 {offsets = [0, 0], sizes = [16, 128], strides = [1, 1]} : vector<16x384xbf16> to vector<16x128xbf16>
    %c208 = arith.constant 208 : index
    %c0_45 = arith.constant 0 : index
    %101 = vector.load %arg4[%c208, %c0_45] : memref<816x256xbf16, #tpu.memory_space<vmem>>, vector<16x128xbf16>
    tpu.vector_store %arg4[%c208, %c0_45], %100 {strides = array<i32>} : memref<816x256xbf16, #tpu.memory_space<vmem>>, vector<16x128xbf16>,
    %102 = vector.extract_strided_slice %99 {offsets = [0, 128], sizes = [16, 128], strides = [1, 1]} : vector<16x384xbf16> to vector<16x128xbf16>
    %c464 = arith.constant 464 : index
    %c0_46 = arith.constant 0 : index
    %103 = vector.load %arg4[%c464, %c0_46] : memref<816x256xbf16, #tpu.memory_space<vmem>>, vector<16x128xbf16>
    tpu.vector_store %arg4[%c464, %c0_46], %102 {strides = array<i32>} : memref<816x256xbf16, #tpu.memory_space<vmem>>, vector<16x128xbf16>,
    %104 = vector.extract_strided_slice %99 {offsets = [0, 256], sizes = [16, 128], strides = [1, 1]} : vector<16x384xbf16> to vector<16x128xbf16>
    %c720 = arith.constant 720 : index
    %c0_47 = arith.constant 0 : index
    %105 = vector.load %arg4[%c720, %c0_47] : memref<816x256xbf16, #tpu.memory_space<vmem>>, vector<16x128xbf16>
    tpu.vector_store %arg4[%c720, %c0_47], %104 {strides = array<i32>} : memref<816x256xbf16, #tpu.memory_space<vmem>>, vector<16x128xbf16>,
    %106 = vector.extract_strided_slice %1 {offsets = [0, 112], sizes = [16, 384], strides = [1, 1]} : vector<16x528xbf16> to vector<16x384xbf16>
    %107 = vector.extract_strided_slice %106 {offsets = [0, 0], sizes = [16, 128], strides = [1, 1]} : vector<16x384xbf16> to vector<16x128xbf16>
    %c224 = arith.constant 224 : index
    %c0_48 = arith.constant 0 : index
    %108 = vector.load %arg4[%c224, %c0_48] : memref<816x256xbf16, #tpu.memory_space<vmem>>, vector<16x128xbf16>
    tpu.vector_store %arg4[%c224, %c0_48], %107 {strides = array<i32>} : memref<816x256xbf16, #tpu.memory_space<vmem>>, vector<16x128xbf16>,
    %109 = vector.extract_strided_slice %106 {offsets = [0, 128], sizes = [16, 128], strides = [1, 1]} : vector<16x384xbf16> to vector<16x128xbf16>
    %c480 = arith.constant 480 : index
    %c0_49 = arith.constant 0 : index
    %110 = vector.load %arg4[%c480, %c0_49] : memref<816x256xbf16, #tpu.memory_space<vmem>>, vector<16x128xbf16>
    tpu.vector_store %arg4[%c480, %c0_49], %109 {strides = array<i32>} : memref<816x256xbf16, #tpu.memory_space<vmem>>, vector<16x128xbf16>,
    %111 = vector.extract_strided_slice %106 {offsets = [0, 256], sizes = [16, 128], strides = [1, 1]} : vector<16x384xbf16> to vector<16x128xbf16>
    %c736 = arith.constant 736 : index
    %c0_50 = arith.constant 0 : index
    %112 = vector.load %arg4[%c736, %c0_50] : memref<816x256xbf16, #tpu.memory_space<vmem>>, vector<16x128xbf16>
    tpu.vector_store %arg4[%c736, %c0_50], %111 {strides = array<i32>} : memref<816x256xbf16, #tpu.memory_space<vmem>>, vector<16x128xbf16>,
    %113 = vector.extract_strided_slice %1 {offsets = [0, 120], sizes = [16, 384], strides = [1, 1]} : vector<16x528xbf16> to vector<16x384xbf16>
    %114 = vector.extract_strided_slice %113 {offsets = [0, 0], sizes = [16, 128], strides = [1, 1]} : vector<16x384xbf16> to vector<16x128xbf16>
    %c240 = arith.constant 240 : index
    %c0_51 = arith.constant 0 : index
    %115 = vector.load %arg4[%c240, %c0_51] : memref<816x256xbf16, #tpu.memory_space<vmem>>, vector<16x128xbf16>
    tpu.vector_store %arg4[%c240, %c0_51], %114 {strides = array<i32>} : memref<816x256xbf16, #tpu.memory_space<vmem>>, vector<16x128xbf16>,
    %116 = vector.extract_strided_slice %113 {offsets = [0, 128], sizes = [16, 128], strides = [1, 1]} : vector<16x384xbf16> to vector<16x128xbf16>
    %c496 = arith.constant 496 : index
    %c0_52 = arith.constant 0 : index
    %117 = vector.load %arg4[%c496, %c0_52] : memref<816x256xbf16, #tpu.memory_space<vmem>>, vector<16x128xbf16>
    tpu.vector_store %arg4[%c496, %c0_52], %116 {strides = array<i32>} : memref<816x256xbf16, #tpu.memory_space<vmem>>, vector<16x128xbf16>,
    %118 = vector.extract_strided_slice %113 {offsets = [0, 256], sizes = [16, 128], strides = [1, 1]} : vector<16x384xbf16> to vector<16x128xbf16>
    %c752 = arith.constant 752 : index
    %c0_53 = arith.constant 0 : index
    %119 = vector.load %arg4[%c752, %c0_53] : memref<816x256xbf16, #tpu.memory_space<vmem>>, vector<16x128xbf16>
    tpu.vector_store %arg4[%c752, %c0_53], %118 {strides = array<i32>} : memref<816x256xbf16, #tpu.memory_space<vmem>>, vector<16x128xbf16>,
    %c1 = arith.constant 1 : index
    %c0_54 = arith.constant 0 : index
    %c0_55 = arith.constant 0 : index
    %120 = vector.load %arg1[%c1, %c0_54, %c0_55] : memref<2x16x528xbf16, #tpu.memory_space<vmem>>, vector<1x16x528xbf16>
    %121 = vector.shape_cast %120 : vector<1x16x528xbf16> to vector<16x528xbf16>
    %122 = vector.extract_strided_slice %121 {offsets = [0, 0], sizes = [16, 512], strides = [1, 1]} : vector<16x528xbf16> to vector<16x512xbf16>
    %123 = vector.extract_strided_slice %122 {offsets = [0, 0], sizes = [16, 128], strides = [1, 1]} : vector<16x512xbf16> to vector<16x128xbf16>
    %c0_56 = arith.constant 0 : index
    %c128_57 = arith.constant 128 : index
    %124 = vector.load %arg4[%c0_56, %c128_57] : memref<816x256xbf16, #tpu.memory_space<vmem>>, vector<16x128xbf16>
    tpu.vector_store %arg4[%c0_56, %c128_57], %123 {strides = array<i32>} : memref<816x256xbf16, #tpu.memory_space<vmem>>, vector<16x128xbf16>,
    %125 = vector.extract_strided_slice %122 {offsets = [0, 128], sizes = [16, 128], strides = [1, 1]} : vector<16x512xbf16> to vector<16x128xbf16>
    %c256_58 = arith.constant 256 : index
    %c128_59 = arith.constant 128 : index
    %126 = vector.load %arg4[%c256_58, %c128_59] : memref<816x256xbf16, #tpu.memory_space<vmem>>, vector<16x128xbf16>
    tpu.vector_store %arg4[%c256_58, %c128_59], %125 {strides = array<i32>} : memref<816x256xbf16, #tpu.memory_space<vmem>>, vector<16x128xbf16>,
    %127 = vector.extract_strided_slice %122 {offsets = [0, 256], sizes = [16, 128], strides = [1, 1]} : vector<16x512xbf16> to vector<16x128xbf16>
    %c512_60 = arith.constant 512 : index
    %c128_61 = arith.constant 128 : index
    %128 = vector.load %arg4[%c512_60, %c128_61] : memref<816x256xbf16, #tpu.memory_space<vmem>>, vector<16x128xbf16>
    tpu.vector_store %arg4[%c512_60, %c128_61], %127 {strides = array<i32>} : memref<816x256xbf16, #tpu.memory_space<vmem>>, vector<16x128xbf16>,
    %129 = vector.extract_strided_slice %122 {offsets = [0, 384], sizes = [16, 128], strides = [1, 1]} : vector<16x512xbf16> to vector<16x128xbf16>
    %c768_62 = arith.constant 768 : index
    %c128_63 = arith.constant 128 : index
    %130 = vector.load %arg4[%c768_62, %c128_63] : memref<816x256xbf16, #tpu.memory_space<vmem>>, vector<16x128xbf16>
    tpu.vector_store %arg4[%c768_62, %c128_63], %129 {strides = array<i32>} : memref<816x256xbf16, #tpu.memory_space<vmem>>, vector<16x128xbf16>,
    %131 = vector.extract_strided_slice %121 {offsets = [0, 8], sizes = [16, 512], strides = [1, 1]} : vector<16x528xbf16> to vector<16x512xbf16>
    %132 = vector.extract_strided_slice %131 {offsets = [0, 0], sizes = [16, 128], strides = [1, 1]} : vector<16x512xbf16> to vector<16x128xbf16>
    %c16_64 = arith.constant 16 : index
    %c128_65 = arith.constant 128 : index
    %133 = vector.load %arg4[%c16_64, %c128_65] : memref<816x256xbf16, #tpu.memory_space<vmem>>, vector<16x128xbf16>
    tpu.vector_store %arg4[%c16_64, %c128_65], %132 {strides = array<i32>} : memref<816x256xbf16, #tpu.memory_space<vmem>>, vector<16x128xbf16>,
    %134 = vector.extract_strided_slice %131 {offsets = [0, 128], sizes = [16, 128], strides = [1, 1]} : vector<16x512xbf16> to vector<16x128xbf16>
    %c272_66 = arith.constant 272 : index
    %c128_67 = arith.constant 128 : index
    %135 = vector.load %arg4[%c272_66, %c128_67] : memref<816x256xbf16, #tpu.memory_space<vmem>>, vector<16x128xbf16>
    tpu.vector_store %arg4[%c272_66, %c128_67], %134 {strides = array<i32>} : memref<816x256xbf16, #tpu.memory_space<vmem>>, vector<16x128xbf16>,
    %136 = vector.extract_strided_slice %131 {offsets = [0, 256], sizes = [16, 128], strides = [1, 1]} : vector<16x512xbf16> to vector<16x128xbf16>
    %c528_68 = arith.constant 528 : index
    %c128_69 = arith.constant 128 : index
    %137 = vector.load %arg4[%c528_68, %c128_69] : memref<816x256xbf16, #tpu.memory_space<vmem>>, vector<16x128xbf16>
    tpu.vector_store %arg4[%c528_68, %c128_69], %136 {strides = array<i32>} : memref<816x256xbf16, #tpu.memory_space<vmem>>, vector<16x128xbf16>,
    %138 = vector.extract_strided_slice %131 {offsets = [0, 384], sizes = [16, 128], strides = [1, 1]} : vector<16x512xbf16> to vector<16x128xbf16>
    %c784_70 = arith.constant 784 : index
    %c128_71 = arith.constant 128 : index
    %139 = vector.load %arg4[%c784_70, %c128_71] : memref<816x256xbf16, #tpu.memory_space<vmem>>, vector<16x128xbf16>
    tpu.vector_store %arg4[%c784_70, %c128_71], %138 {strides = array<i32>} : memref<816x256xbf16, #tpu.memory_space<vmem>>, vector<16x128xbf16>,
    %140 = vector.extract_strided_slice %121 {offsets = [0, 16], sizes = [16, 512], strides = [1, 1]} : vector<16x528xbf16> to vector<16x512xbf16>
    %141 = vector.extract_strided_slice %140 {offsets = [0, 0], sizes = [16, 128], strides = [1, 1]} : vector<16x512xbf16> to vector<16x128xbf16>
    %c32_72 = arith.constant 32 : index
    %c128_73 = arith.constant 128 : index
    %142 = vector.load %arg4[%c32_72, %c128_73] : memref<816x256xbf16, #tpu.memory_space<vmem>>, vector<16x128xbf16>
    tpu.vector_store %arg4[%c32_72, %c128_73], %141 {strides = array<i32>} : memref<816x256xbf16, #tpu.memory_space<vmem>>, vector<16x128xbf16>,
    %143 = vector.extract_strided_slice %140 {offsets = [0, 128], sizes = [16, 128], strides = [1, 1]} : vector<16x512xbf16> to vector<16x128xbf16>
    %c288_74 = arith.constant 288 : index
    %c128_75 = arith.constant 128 : index
    %144 = vector.load %arg4[%c288_74, %c128_75] : memref<816x256xbf16, #tpu.memory_space<vmem>>, vector<16x128xbf16>
    tpu.vector_store %arg4[%c288_74, %c128_75], %143 {strides = array<i32>} : memref<816x256xbf16, #tpu.memory_space<vmem>>, vector<16x128xbf16>,
    %145 = vector.extract_strided_slice %140 {offsets = [0, 256], sizes = [16, 128], strides = [1, 1]} : vector<16x512xbf16> to vector<16x128xbf16>
    %c544_76 = arith.constant 544 : index
    %c128_77 = arith.constant 128 : index
    %146 = vector.load %arg4[%c544_76, %c128_77] : memref<816x256xbf16, #tpu.memory_space<vmem>>, vector<16x128xbf16>
    tpu.vector_store %arg4[%c544_76, %c128_77], %145 {strides = array<i32>} : memref<816x256xbf16, #tpu.memory_space<vmem>>, vector<16x128xbf16>,
    %147 = vector.extract_strided_slice %140 {offsets = [0, 384], sizes = [16, 128], strides = [1, 1]} : vector<16x512xbf16> to vector<16x128xbf16>
    %c800_78 = arith.constant 800 : index
    %c128_79 = arith.constant 128 : index
    %148 = vector.load %arg4[%c800_78, %c128_79] : memref<816x256xbf16, #tpu.memory_space<vmem>>, vector<16x128xbf16>
    tpu.vector_store %arg4[%c800_78, %c128_79], %147 {strides = array<i32>} : memref<816x256xbf16, #tpu.memory_space<vmem>>, vector<16x128xbf16>,
    %149 = vector.extract_strided_slice %121 {offsets = [0, 24], sizes = [16, 384], strides = [1, 1]} : vector<16x528xbf16> to vector<16x384xbf16>
    %150 = vector.extract_strided_slice %149 {offsets = [0, 0], sizes = [16, 128], strides = [1, 1]} : vector<16x384xbf16> to vector<16x128xbf16>
    %c48_80 = arith.constant 48 : index
    %c128_81 = arith.constant 128 : index
    %151 = vector.load %arg4[%c48_80, %c128_81] : memref<816x256xbf16, #tpu.memory_space<vmem>>, vector<16x128xbf16>
    tpu.vector_store %arg4[%c48_80, %c128_81], %150 {strides = array<i32>} : memref<816x256xbf16, #tpu.memory_space<vmem>>, vector<16x128xbf16>,
    %152 = vector.extract_strided_slice %149 {offsets = [0, 128], sizes = [16, 128], strides = [1, 1]} : vector<16x384xbf16> to vector<16x128xbf16>
    %c304_82 = arith.constant 304 : index
    %c128_83 = arith.constant 128 : index
    %153 = vector.load %arg4[%c304_82, %c128_83] : memref<816x256xbf16, #tpu.memory_space<vmem>>, vector<16x128xbf16>
    tpu.vector_store %arg4[%c304_82, %c128_83], %152 {strides = array<i32>} : memref<816x256xbf16, #tpu.memory_space<vmem>>, vector<16x128xbf16>,
    %154 = vector.extract_strided_slice %149 {offsets = [0, 256], sizes = [16, 128], strides = [1, 1]} : vector<16x384xbf16> to vector<16x128xbf16>
    %c560_84 = arith.constant 560 : index
    %c128_85 = arith.constant 128 : index
    %155 = vector.load %arg4[%c560_84, %c128_85] : memref<816x256xbf16, #tpu.memory_space<vmem>>, vector<16x128xbf16>
    tpu.vector_store %arg4[%c560_84, %c128_85], %154 {strides = array<i32>} : memref<816x256xbf16, #tpu.memory_space<vmem>>, vector<16x128xbf16>,
    %156 = vector.extract_strided_slice %121 {offsets = [0, 32], sizes = [16, 384], strides = [1, 1]} : vector<16x528xbf16> to vector<16x384xbf16>
    %157 = vector.extract_strided_slice %156 {offsets = [0, 0], sizes = [16, 128], strides = [1, 1]} : vector<16x384xbf16> to vector<16x128xbf16>
    %c64_86 = arith.constant 64 : index
    %c128_87 = arith.constant 128 : index
    %158 = vector.load %arg4[%c64_86, %c128_87] : memref<816x256xbf16, #tpu.memory_space<vmem>>, vector<16x128xbf16>
    tpu.vector_store %arg4[%c64_86, %c128_87], %157 {strides = array<i32>} : memref<816x256xbf16, #tpu.memory_space<vmem>>, vector<16x128xbf16>,
    %159 = vector.extract_strided_slice %156 {offsets = [0, 128], sizes = [16, 128], strides = [1, 1]} : vector<16x384xbf16> to vector<16x128xbf16>
    %c320_88 = arith.constant 320 : index
    %c128_89 = arith.constant 128 : index
    %160 = vector.load %arg4[%c320_88, %c128_89] : memref<816x256xbf16, #tpu.memory_space<vmem>>, vector<16x128xbf16>
    tpu.vector_store %arg4[%c320_88, %c128_89], %159 {strides = array<i32>} : memref<816x256xbf16, #tpu.memory_space<vmem>>, vector<16x128xbf16>,
    %161 = vector.extract_strided_slice %156 {offsets = [0, 256], sizes = [16, 128], strides = [1, 1]} : vector<16x384xbf16> to vector<16x128xbf16>
    %c576_90 = arith.constant 576 : index
    %c128_91 = arith.constant 128 : index
    %162 = vector.load %arg4[%c576_90, %c128_91] : memref<816x256xbf16, #tpu.memory_space<vmem>>, vector<16x128xbf16>
    tpu.vector_store %arg4[%c576_90, %c128_91], %161 {strides = array<i32>} : memref<816x256xbf16, #tpu.memory_space<vmem>>, vector<16x128xbf16>,
    %163 = vector.extract_strided_slice %121 {offsets = [0, 40], sizes = [16, 384], strides = [1, 1]} : vector<16x528xbf16> to vector<16x384xbf16>
    %164 = vector.extract_strided_slice %163 {offsets = [0, 0], sizes = [16, 128], strides = [1, 1]} : vector<16x384xbf16> to vector<16x128xbf16>
    %c80_92 = arith.constant 80 : index
    %c128_93 = arith.constant 128 : index
    %165 = vector.load %arg4[%c80_92, %c128_93] : memref<816x256xbf16, #tpu.memory_space<vmem>>, vector<16x128xbf16>
    tpu.vector_store %arg4[%c80_92, %c128_93], %164 {strides = array<i32>} : memref<816x256xbf16, #tpu.memory_space<vmem>>, vector<16x128xbf16>,
    %166 = vector.extract_strided_slice %163 {offsets = [0, 128], sizes = [16, 128], strides = [1, 1]} : vector<16x384xbf16> to vector<16x128xbf16>
    %c336_94 = arith.constant 336 : index
    %c128_95 = arith.constant 128 : index
    %167 = vector.load %arg4[%c336_94, %c128_95] : memref<816x256xbf16, #tpu.memory_space<vmem>>, vector<16x128xbf16>
    tpu.vector_store %arg4[%c336_94, %c128_95], %166 {strides = array<i32>} : memref<816x256xbf16, #tpu.memory_space<vmem>>, vector<16x128xbf16>,
    %168 = vector.extract_strided_slice %163 {offsets = [0, 256], sizes = [16, 128], strides = [1, 1]} : vector<16x384xbf16> to vector<16x128xbf16>
    %c592_96 = arith.constant 592 : index
    %c128_97 = arith.constant 128 : index
    %169 = vector.load %arg4[%c592_96, %c128_97] : memref<816x256xbf16, #tpu.memory_space<vmem>>, vector<16x128xbf16>
    tpu.vector_store %arg4[%c592_96, %c128_97], %168 {strides = array<i32>} : memref<816x256xbf16, #tpu.memory_space<vmem>>, vector<16x128xbf16>,
    %170 = vector.extract_strided_slice %121 {offsets = [0, 48], sizes = [16, 384], strides = [1, 1]} : vector<16x528xbf16> to vector<16x384xbf16>
    %171 = vector.extract_strided_slice %170 {offsets = [0, 0], sizes = [16, 128], strides = [1, 1]} : vector<16x384xbf16> to vector<16x128xbf16>
    %c96_98 = arith.constant 96 : index
    %c128_99 = arith.constant 128 : index
    %172 = vector.load %arg4[%c96_98, %c128_99] : memref<816x256xbf16, #tpu.memory_space<vmem>>, vector<16x128xbf16>
    tpu.vector_store %arg4[%c96_98, %c128_99], %171 {strides = array<i32>} : memref<816x256xbf16, #tpu.memory_space<vmem>>, vector<16x128xbf16>,
    %173 = vector.extract_strided_slice %170 {offsets = [0, 128], sizes = [16, 128], strides = [1, 1]} : vector<16x384xbf16> to vector<16x128xbf16>
    %c352_100 = arith.constant 352 : index
    %c128_101 = arith.constant 128 : index
    %174 = vector.load %arg4[%c352_100, %c128_101] : memref<816x256xbf16, #tpu.memory_space<vmem>>, vector<16x128xbf16>
    tpu.vector_store %arg4[%c352_100, %c128_101], %173 {strides = array<i32>} : memref<816x256xbf16, #tpu.memory_space<vmem>>, vector<16x128xbf16>,
    %175 = vector.extract_strided_slice %170 {offsets = [0, 256], sizes = [16, 128], strides = [1, 1]} : vector<16x384xbf16> to vector<16x128xbf16>
    %c608_102 = arith.constant 608 : index
    %c128_103 = arith.constant 128 : index
    %176 = vector.load %arg4[%c608_102, %c128_103] : memref<816x256xbf16, #tpu.memory_space<vmem>>, vector<16x128xbf16>
    tpu.vector_store %arg4[%c608_102, %c128_103], %175 {strides = array<i32>} : memref<816x256xbf16, #tpu.memory_space<vmem>>, vector<16x128xbf16>,
    %177 = vector.extract_strided_slice %121 {offsets = [0, 56], sizes = [16, 384], strides = [1, 1]} : vector<16x528xbf16> to vector<16x384xbf16>
    %178 = vector.extract_strided_slice %177 {offsets = [0, 0], sizes = [16, 128], strides = [1, 1]} : vector<16x384xbf16> to vector<16x128xbf16>
    %c112_104 = arith.constant 112 : index
    %c128_105 = arith.constant 128 : index
    %179 = vector.load %arg4[%c112_104, %c128_105] : memref<816x256xbf16, #tpu.memory_space<vmem>>, vector<16x128xbf16>
    tpu.vector_store %arg4[%c112_104, %c128_105], %178 {strides = array<i32>} : memref<816x256xbf16, #tpu.memory_space<vmem>>, vector<16x128xbf16>,
    %180 = vector.extract_strided_slice %177 {offsets = [0, 128], sizes = [16, 128], strides = [1, 1]} : vector<16x384xbf16> to vector<16x128xbf16>
    %c368_106 = arith.constant 368 : index
    %c128_107 = arith.constant 128 : index
    %181 = vector.load %arg4[%c368_106, %c128_107] : memref<816x256xbf16, #tpu.memory_space<vmem>>, vector<16x128xbf16>
    tpu.vector_store %arg4[%c368_106, %c128_107], %180 {strides = array<i32>} : memref<816x256xbf16, #tpu.memory_space<vmem>>, vector<16x128xbf16>,
    %182 = vector.extract_strided_slice %177 {offsets = [0, 256], sizes = [16, 128], strides = [1, 1]} : vector<16x384xbf16> to vector<16x128xbf16>
    %c624_108 = arith.constant 624 : index
    %c128_109 = arith.constant 128 : index
    %183 = vector.load %arg4[%c624_108, %c128_109] : memref<816x256xbf16, #tpu.memory_space<vmem>>, vector<16x128xbf16>
    tpu.vector_store %arg4[%c624_108, %c128_109], %182 {strides = array<i32>} : memref<816x256xbf16, #tpu.memory_space<vmem>>, vector<16x128xbf16>,
    %184 = vector.extract_strided_slice %121 {offsets = [0, 64], sizes = [16, 384], strides = [1, 1]} : vector<16x528xbf16> to vector<16x384xbf16>
    %185 = vector.extract_strided_slice %184 {offsets = [0, 0], sizes = [16, 128], strides = [1, 1]} : vector<16x384xbf16> to vector<16x128xbf16>
    %c128_110 = arith.constant 128 : index
    %c128_111 = arith.constant 128 : index
    %186 = vector.load %arg4[%c128_110, %c128_111] : memref<816x256xbf16, #tpu.memory_space<vmem>>, vector<16x128xbf16>
    tpu.vector_store %arg4[%c128_110, %c128_111], %185 {strides = array<i32>} : memref<816x256xbf16, #tpu.memory_space<vmem>>, vector<16x128xbf16>,
    %187 = vector.extract_strided_slice %184 {offsets = [0, 128], sizes = [16, 128], strides = [1, 1]} : vector<16x384xbf16> to vector<16x128xbf16>
    %c384_112 = arith.constant 384 : index
    %c128_113 = arith.constant 128 : index
    %188 = vector.load %arg4[%c384_112, %c128_113] : memref<816x256xbf16, #tpu.memory_space<vmem>>, vector<16x128xbf16>
    tpu.vector_store %arg4[%c384_112, %c128_113], %187 {strides = array<i32>} : memref<816x256xbf16, #tpu.memory_space<vmem>>, vector<16x128xbf16>,
    %189 = vector.extract_strided_slice %184 {offsets = [0, 256], sizes = [16, 128], strides = [1, 1]} : vector<16x384xbf16> to vector<16x128xbf16>
    %c640_114 = arith.constant 640 : index
    %c128_115 = arith.constant 128 : index
    %190 = vector.load %arg4[%c640_114, %c128_115] : memref<816x256xbf16, #tpu.memory_space<vmem>>, vector<16x128xbf16>
    tpu.vector_store %arg4[%c640_114, %c128_115], %189 {strides = array<i32>} : memref<816x256xbf16, #tpu.memory_space<vmem>>, vector<16x128xbf16>,
    %191 = vector.extract_strided_slice %121 {offsets = [0, 72], sizes = [16, 384], strides = [1, 1]} : vector<16x528xbf16> to vector<16x384xbf16>
    %192 = vector.extract_strided_slice %191 {offsets = [0, 0], sizes = [16, 128], strides = [1, 1]} : vector<16x384xbf16> to vector<16x128xbf16>
    %c144_116 = arith.constant 144 : index
    %c128_117 = arith.constant 128 : index
    %193 = vector.load %arg4[%c144_116, %c128_117] : memref<816x256xbf16, #tpu.memory_space<vmem>>, vector<16x128xbf16>
    tpu.vector_store %arg4[%c144_116, %c128_117], %192 {strides = array<i32>} : memref<816x256xbf16, #tpu.memory_space<vmem>>, vector<16x128xbf16>,
    %194 = vector.extract_strided_slice %191 {offsets = [0, 128], sizes = [16, 128], strides = [1, 1]} : vector<16x384xbf16> to vector<16x128xbf16>
    %c400_118 = arith.constant 400 : index
    %c128_119 = arith.constant 128 : index
    %195 = vector.load %arg4[%c400_118, %c128_119] : memref<816x256xbf16, #tpu.memory_space<vmem>>, vector<16x128xbf16>
    tpu.vector_store %arg4[%c400_118, %c128_119], %194 {strides = array<i32>} : memref<816x256xbf16, #tpu.memory_space<vmem>>, vector<16x128xbf16>,
    %196 = vector.extract_strided_slice %191 {offsets = [0, 256], sizes = [16, 128], strides = [1, 1]} : vector<16x384xbf16> to vector<16x128xbf16>
    %c656_120 = arith.constant 656 : index
    %c128_121 = arith.constant 128 : index
    %197 = vector.load %arg4[%c656_120, %c128_121] : memref<816x256xbf16, #tpu.memory_space<vmem>>, vector<16x128xbf16>
    tpu.vector_store %arg4[%c656_120, %c128_121], %196 {strides = array<i32>} : memref<816x256xbf16, #tpu.memory_space<vmem>>, vector<16x128xbf16>,
    %198 = vector.extract_strided_slice %121 {offsets = [0, 80], sizes = [16, 384], strides = [1, 1]} : vector<16x528xbf16> to vector<16x384xbf16>
    %199 = vector.extract_strided_slice %198 {offsets = [0, 0], sizes = [16, 128], strides = [1, 1]} : vector<16x384xbf16> to vector<16x128xbf16>
    %c160_122 = arith.constant 160 : index
    %c128_123 = arith.constant 128 : index
    %200 = vector.load %arg4[%c160_122, %c128_123] : memref<816x256xbf16, #tpu.memory_space<vmem>>, vector<16x128xbf16>
    tpu.vector_store %arg4[%c160_122, %c128_123], %199 {strides = array<i32>} : memref<816x256xbf16, #tpu.memory_space<vmem>>, vector<16x128xbf16>,
    %201 = vector.extract_strided_slice %198 {offsets = [0, 128], sizes = [16, 128], strides = [1, 1]} : vector<16x384xbf16> to vector<16x128xbf16>
    %c416_124 = arith.constant 416 : index
    %c128_125 = arith.constant 128 : index
    %202 = vector.load %arg4[%c416_124, %c128_125] : memref<816x256xbf16, #tpu.memory_space<vmem>>, vector<16x128xbf16>
    tpu.vector_store %arg4[%c416_124, %c128_125], %201 {strides = array<i32>} : memref<816x256xbf16, #tpu.memory_space<vmem>>, vector<16x128xbf16>,
    %203 = vector.extract_strided_slice %198 {offsets = [0, 256], sizes = [16, 128], strides = [1, 1]} : vector<16x384xbf16> to vector<16x128xbf16>
    %c672_126 = arith.constant 672 : index
    %c128_127 = arith.constant 128 : index
    %204 = vector.load %arg4[%c672_126, %c128_127] : memref<816x256xbf16, #tpu.memory_space<vmem>>, vector<16x128xbf16>
    tpu.vector_store %arg4[%c672_126, %c128_127], %203 {strides = array<i32>} : memref<816x256xbf16, #tpu.memory_space<vmem>>, vector<16x128xbf16>,
    %205 = vector.extract_strided_slice %121 {offsets = [0, 88], sizes = [16, 384], strides = [1, 1]} : vector<16x528xbf16> to vector<16x384xbf16>
    %206 = vector.extract_strided_slice %205 {offsets = [0, 0], sizes = [16, 128], strides = [1, 1]} : vector<16x384xbf16> to vector<16x128xbf16>
    %c176_128 = arith.constant 176 : index
    %c128_129 = arith.constant 128 : index
    %207 = vector.load %arg4[%c176_128, %c128_129] : memref<816x256xbf16, #tpu.memory_space<vmem>>, vector<16x128xbf16>
    tpu.vector_store %arg4[%c176_128, %c128_129], %206 {strides = array<i32>} : memref<816x256xbf16, #tpu.memory_space<vmem>>, vector<16x128xbf16>,
    %208 = vector.extract_strided_slice %205 {offsets = [0, 128], sizes = [16, 128], strides = [1, 1]} : vector<16x384xbf16> to vector<16x128xbf16>
    %c432_130 = arith.constant 432 : index
    %c128_131 = arith.constant 128 : index
    %209 = vector.load %arg4[%c432_130, %c128_131] : memref<816x256xbf16, #tpu.memory_space<vmem>>, vector<16x128xbf16>
    tpu.vector_store %arg4[%c432_130, %c128_131], %208 {strides = array<i32>} : memref<816x256xbf16, #tpu.memory_space<vmem>>, vector<16x128xbf16>,
    %210 = vector.extract_strided_slice %205 {offsets = [0, 256], sizes = [16, 128], strides = [1, 1]} : vector<16x384xbf16> to vector<16x128xbf16>
    %c688_132 = arith.constant 688 : index
    %c128_133 = arith.constant 128 : index
    %211 = vector.load %arg4[%c688_132, %c128_133] : memref<816x256xbf16, #tpu.memory_space<vmem>>, vector<16x128xbf16>
    tpu.vector_store %arg4[%c688_132, %c128_133], %210 {strides = array<i32>} : memref<816x256xbf16, #tpu.memory_space<vmem>>, vector<16x128xbf16>,
    %212 = vector.extract_strided_slice %121 {offsets = [0, 96], sizes = [16, 384], strides = [1, 1]} : vector<16x528xbf16> to vector<16x384xbf16>
    %213 = vector.extract_strided_slice %212 {offsets = [0, 0], sizes = [16, 128], strides = [1, 1]} : vector<16x384xbf16> to vector<16x128xbf16>
    %c192_134 = arith.constant 192 : index
    %c128_135 = arith.constant 128 : index
    %214 = vector.load %arg4[%c192_134, %c128_135] : memref<816x256xbf16, #tpu.memory_space<vmem>>, vector<16x128xbf16>
    tpu.vector_store %arg4[%c192_134, %c128_135], %213 {strides = array<i32>} : memref<816x256xbf16, #tpu.memory_space<vmem>>, vector<16x128xbf16>,
    %215 = vector.extract_strided_slice %212 {offsets = [0, 128], sizes = [16, 128], strides = [1, 1]} : vector<16x384xbf16> to vector<16x128xbf16>
    %c448_136 = arith.constant 448 : index
    %c128_137 = arith.constant 128 : index
    %216 = vector.load %arg4[%c448_136, %c128_137] : memref<816x256xbf16, #tpu.memory_space<vmem>>, vector<16x128xbf16>
    tpu.vector_store %arg4[%c448_136, %c128_137], %215 {strides = array<i32>} : memref<816x256xbf16, #tpu.memory_space<vmem>>, vector<16x128xbf16>,
    %217 = vector.extract_strided_slice %212 {offsets = [0, 256], sizes = [16, 128], strides = [1, 1]} : vector<16x384xbf16> to vector<16x128xbf16>
    %c704_138 = arith.constant 704 : index
    %c128_139 = arith.constant 128 : index
    %218 = vector.load %arg4[%c704_138, %c128_139] : memref<816x256xbf16, #tpu.memory_space<vmem>>, vector<16x128xbf16>
    tpu.vector_store %arg4[%c704_138, %c128_139], %217 {strides = array<i32>} : memref<816x256xbf16, #tpu.memory_space<vmem>>, vector<16x128xbf16>,
    %219 = vector.extract_strided_slice %121 {offsets = [0, 104], sizes = [16, 384], strides = [1, 1]} : vector<16x528xbf16> to vector<16x384xbf16>
    %220 = vector.extract_strided_slice %219 {offsets = [0, 0], sizes = [16, 128], strides = [1, 1]} : vector<16x384xbf16> to vector<16x128xbf16>
    %c208_140 = arith.constant 208 : index
    %c128_141 = arith.constant 128 : index
    %221 = vector.load %arg4[%c208_140, %c128_141] : memref<816x256xbf16, #tpu.memory_space<vmem>>, vector<16x128xbf16>
    tpu.vector_store %arg4[%c208_140, %c128_141], %220 {strides = array<i32>} : memref<816x256xbf16, #tpu.memory_space<vmem>>, vector<16x128xbf16>,
    %222 = vector.extract_strided_slice %219 {offsets = [0, 128], sizes = [16, 128], strides = [1, 1]} : vector<16x384xbf16> to vector<16x128xbf16>
    %c464_142 = arith.constant 464 : index
    %c128_143 = arith.constant 128 : index
    %223 = vector.load %arg4[%c464_142, %c128_143] : memref<816x256xbf16, #tpu.memory_space<vmem>>, vector<16x128xbf16>
    tpu.vector_store %arg4[%c464_142, %c128_143], %222 {strides = array<i32>} : memref<816x256xbf16, #tpu.memory_space<vmem>>, vector<16x128xbf16>,
    %224 = vector.extract_strided_slice %219 {offsets = [0, 256], sizes = [16, 128], strides = [1, 1]} : vector<16x384xbf16> to vector<16x128xbf16>
    %c720_144 = arith.constant 720 : index
    %c128_145 = arith.constant 128 : index
    %225 = vector.load %arg4[%c720_144, %c128_145] : memref<816x256xbf16, #tpu.memory_space<vmem>>, vector<16x128xbf16>
    tpu.vector_store %arg4[%c720_144, %c128_145], %224 {strides = array<i32>} : memref<816x256xbf16, #tpu.memory_space<vmem>>, vector<16x128xbf16>,
    %226 = vector.extract_strided_slice %121 {offsets = [0, 112], sizes = [16, 384], strides = [1, 1]} : vector<16x528xbf16> to vector<16x384xbf16>
    %227 = vector.extract_strided_slice %226 {offsets = [0, 0], sizes = [16, 128], strides = [1, 1]} : vector<16x384xbf16> to vector<16x128xbf16>
    %c224_146 = arith.constant 224 : index
    %c128_147 = arith.constant 128 : index
    %228 = vector.load %arg4[%c224_146, %c128_147] : memref<816x256xbf16, #tpu.memory_space<vmem>>, vector<16x128xbf16>
    tpu.vector_store %arg4[%c224_146, %c128_147], %227 {strides = array<i32>} : memref<816x256xbf16, #tpu.memory_space<vmem>>, vector<16x128xbf16>,
    %229 = vector.extract_strided_slice %226 {offsets = [0, 128], sizes = [16, 128], strides = [1, 1]} : vector<16x384xbf16> to vector<16x128xbf16>
    %c480_148 = arith.constant 480 : index
    %c128_149 = arith.constant 128 : index
    %230 = vector.load %arg4[%c480_148, %c128_149] : memref<816x256xbf16, #tpu.memory_space<vmem>>, vector<16x128xbf16>
    tpu.vector_store %arg4[%c480_148, %c128_149], %229 {strides = array<i32>} : memref<816x256xbf16, #tpu.memory_space<vmem>>, vector<16x128xbf16>,
    %231 = vector.extract_strided_slice %226 {offsets = [0, 256], sizes = [16, 128], strides = [1, 1]} : vector<16x384xbf16> to vector<16x128xbf16>
    %c736_150 = arith.constant 736 : index
    %c128_151 = arith.constant 128 : index
    %232 = vector.load %arg4[%c736_150, %c128_151] : memref<816x256xbf16, #tpu.memory_space<vmem>>, vector<16x128xbf16>
    tpu.vector_store %arg4[%c736_150, %c128_151], %231 {strides = array<i32>} : memref<816x256xbf16, #tpu.memory_space<vmem>>, vector<16x128xbf16>,
    %233 = vector.extract_strided_slice %121 {offsets = [0, 120], sizes = [16, 384], strides = [1, 1]} : vector<16x528xbf16> to vector<16x384xbf16>
    %234 = vector.extract_strided_slice %233 {offsets = [0, 0], sizes = [16, 128], strides = [1, 1]} : vector<16x384xbf16> to vector<16x128xbf16>
    %c240_152 = arith.constant 240 : index
    %c128_153 = arith.constant 128 : index
    %235 = vector.load %arg4[%c240_152, %c128_153] : memref<816x256xbf16, #tpu.memory_space<vmem>>, vector<16x128xbf16>
    tpu.vector_store %arg4[%c240_152, %c128_153], %234 {strides = array<i32>} : memref<816x256xbf16, #tpu.memory_space<vmem>>, vector<16x128xbf16>,
    %236 = vector.extract_strided_slice %233 {offsets = [0, 128], sizes = [16, 128], strides = [1, 1]} : vector<16x384xbf16> to vector<16x128xbf16>
    %c496_154 = arith.constant 496 : index
    %c128_155 = arith.constant 128 : index
    %237 = vector.load %arg4[%c496_154, %c128_155] : memref<816x256xbf16, #tpu.memory_space<vmem>>, vector<16x128xbf16>
    tpu.vector_store %arg4[%c496_154, %c128_155], %236 {strides = array<i32>} : memref<816x256xbf16, #tpu.memory_space<vmem>>, vector<16x128xbf16>,
    %238 = vector.extract_strided_slice %233 {offsets = [0, 256], sizes = [16, 128], strides = [1, 1]} : vector<16x384xbf16> to vector<16x128xbf16>
    %c752_156 = arith.constant 752 : index
    %c128_157 = arith.constant 128 : index
    %239 = vector.load %arg4[%c752_156, %c128_157] : memref<816x256xbf16, #tpu.memory_space<vmem>>, vector<16x128xbf16>
    tpu.vector_store %arg4[%c752_156, %c128_157], %238 {strides = array<i32>} : memref<816x256xbf16, #tpu.memory_space<vmem>>, vector<16x128xbf16>,
    %cst = arith.constant 0.000000e+00 : f32
    %240 = vector.broadcast %cst : f32 to vector<16x256xf32>
    %c0_158 = arith.constant 0 : index
    %c0_159 = arith.constant 0 : index
    %241 = vector.load %arg2[%c0_158, %c0_159] : memref<16x816xbf16, #tpu.memory_space<vmem>>, vector<16x256xbf16>
    %c0_160 = arith.constant 0 : index
    %c0_161 = arith.constant 0 : index
    %242 = vector.load %arg4[%c0_160, %c0_161] : memref<816x256xbf16, #tpu.memory_space<vmem>>, vector<256x256xbf16>
    %cst_162 = arith.constant dense<0.000000e+00> : vector<16x256xf32>
    %243 = tpu.matmul %241, %242, %cst_162 {dimension_numbers = #tpu.dot_dimension_numbers<[1], [0], [0], [1], [0, 0, 1, 1], [], []>} : vector<16x256xbf16>, vector<256x256xbf16>, vector<16x256xf32> -> vector<16x256xf32>
    %244 = arith.addf %240, %243 : vector<16x256xf32>
    %c0_163 = arith.constant 0 : index
    %c256_164 = arith.constant 256 : index
    %245 = vector.load %arg2[%c0_163, %c256_164] : memref<16x816xbf16, #tpu.memory_space<vmem>>, vector<16x256xbf16>
    %c256_165 = arith.constant 256 : index
    %c0_166 = arith.constant 0 : index
    %246 = vector.load %arg4[%c256_165, %c0_166] : memref<816x256xbf16, #tpu.memory_space<vmem>>, vector<256x256xbf16>
    %cst_167 = arith.constant dense<0.000000e+00> : vector<16x256xf32>
    %247 = tpu.matmul %245, %246, %cst_167 {dimension_numbers = #tpu.dot_dimension_numbers<[1], [0], [0], [1], [0, 0, 1, 1], [], []>} : vector<16x256xbf16>, vector<256x256xbf16>, vector<16x256xf32> -> vector<16x256xf32>
    %248 = arith.addf %244, %247 : vector<16x256xf32>
    %c0_168 = arith.constant 0 : index
    %c512_169 = arith.constant 512 : index
    %249 = vector.load %arg2[%c0_168, %c512_169] : memref<16x816xbf16, #tpu.memory_space<vmem>>, vector<16x256xbf16>
    %c512_170 = arith.constant 512 : index
    %c0_171 = arith.constant 0 : index
    %250 = vector.load %arg4[%c512_170, %c0_171] : memref<816x256xbf16, #tpu.memory_space<vmem>>, vector<256x256xbf16>
    %cst_172 = arith.constant dense<0.000000e+00> : vector<16x256xf32>
    %251 = tpu.matmul %249, %250, %cst_172 {dimension_numbers = #tpu.dot_dimension_numbers<[1], [0], [0], [1], [0, 0, 1, 1], [], []>} : vector<16x256xbf16>, vector<256x256xbf16>, vector<16x256xf32> -> vector<16x256xf32>
    %252 = arith.addf %248, %251 : vector<16x256xf32>
    %c0_173 = arith.constant 0 : index
    %c768_174 = arith.constant 768 : index
    %253 = vector.load %arg2[%c0_173, %c768_174] : memref<16x816xbf16, #tpu.memory_space<vmem>>, vector<16x48xbf16>
    %c768_175 = arith.constant 768 : index
    %c0_176 = arith.constant 0 : index
    %254 = vector.load %arg4[%c768_175, %c0_176] : memref<816x256xbf16, #tpu.memory_space<vmem>>, vector<48x256xbf16>
    %cst_177 = arith.constant dense<0.000000e+00> : vector<16x256xf32>
    %255 = tpu.matmul %253, %254, %cst_177 {dimension_numbers = #tpu.dot_dimension_numbers<[1], [0], [0], [1], [0, 0, 1, 1], [], []>} : vector<16x48xbf16>, vector<48x256xbf16>, vector<16x256xf32> -> vector<16x256xf32>
    %256 = arith.addf %252, %255 : vector<16x256xf32>
    %257 = vector.extract_strided_slice %256 {offsets = [0, 0], sizes = [16, 128], strides = [1, 1]} : vector<16x256xf32> to vector<16x128xf32>
    %c0_178 = arith.constant 0 : index
    %c0_179 = arith.constant 0 : index
    %c0_180 = arith.constant 0 : index
    %258 = vector.load %arg3[%c0_178, %c0_179, %c0_180] : memref<2x16x128xf32, #tpu.memory_space<vmem>>, vector<1x16x128xf32>
    %259 = vector.shape_cast %258 : vector<1x16x128xf32> to vector<16x128xf32>
    %260 = vector.shape_cast %257 : vector<16x128xf32> to vector<1x16x128xf32>
    tpu.vector_store %arg3[%c0_178, %c0_179, %c0_180], %260 {strides = array<i32>} : memref<2x16x128xf32, #tpu.memory_space<vmem>>, vector<1x16x128xf32>,
    %261 = vector.extract_strided_slice %256 {offsets = [0, 128], sizes = [16, 128], strides = [1, 1]} : vector<16x256xf32> to vector<16x128xf32>
    %c1_181 = arith.constant 1 : index
    %c0_182 = arith.constant 0 : index
    %c0_183 = arith.constant 0 : index
    %262 = vector.load %arg3[%c1_181, %c0_182, %c0_183] : memref<2x16x128xf32, #tpu.memory_space<vmem>>, vector<1x16x128xf32>
    %263 = vector.shape_cast %262 : vector<1x16x128xf32> to vector<16x128xf32>
    %264 = vector.shape_cast %261 : vector<16x128xf32> to vector<1x16x128xf32>
    tpu.vector_store %arg3[%c1_181, %c0_182, %c0_183], %264 {strides = array<i32>} : memref<2x16x128xf32, #tpu.memory_space<vmem>>, vector<1x16x128xf32>,
    return
  }
  func.func @transform_0(%arg0: i32) -> (i32, i32, i32) {
    %c0_i32 = arith.constant 0 : i32
    %c0_i32_0 = arith.constant 0 : i32
    %c0_i32_1 = arith.constant 0 : i32
    return %arg0, %c0_i32, %c0_i32_0 : i32, i32, i32
  }
  func.func @transform_1(%arg0: i32) -> (i32, i32) {
    %c0_i32 = arith.constant 0 : i32
    %c0_i32_0 = arith.constant 0 : i32
    %c0_i32_1 = arith.constant 0 : i32
    return %c0_i32, %c0_i32_0 : i32, i32
  }
  func.func @transform_2(%arg0: i32) -> (i32, i32, i32) {
    %c0_i32 = arith.constant 0 : i32
    %c0_i32_0 = arith.constant 0 : i32
    %c0_i32_1 = arith.constant 0 : i32
    return %arg0, %c0_i32, %c0_i32_0 : i32, i32, i32
  }
}

</mosaic_0001>

<bundles_post_ra>
// kernel: tpu_custom_call.1
= control target key start
LH: loop header
LB: loop body
LE: loop exit
PB: predicated region body
PF: predicated region fallthrough
CT: control target
= control target key end

     0   :  { %7 = vsyncpa [#allocation4], 0  ;;  %s2393_s0 = inlined_call_operand.hbm [shape: bf16[4,16,528], index: 0, kind: input, shape index: {}]   ;;  %s2394_s1 = inlined_call_operand.hbm [shape: bf16[16,816], index: 1, kind: input, shape index: {}]   ;;  %s2395_s2 = inlined_call_operand.hbm [shape: f32[4,16,128], index: 2, kind: output, shape index: {}]  }
   0x1   :  { %9 = vsyncpa [#allocation4 + $0x1], 0 }
   0x2   :  { %10 = vsyncpa [#allocation7], 0 }
   0x3   :  { %11 = vsyncpa [#allocation5], 0 }
   0x4   :  { %13 = vsyncpa [#allocation5 + $0x1], 0  ;;  %s1559_s9 = smov 0   ;;  %s1561_s10 = smov 0  }
   0x5   :  { %s1563_s11 = smov 0   ;;  %s1565_s12 = smov 0  }
   0x6 LB: > { %s1580_s13 = sadd.s32 4294967295, %s1518_s12   ;;  %s1229_s14 = sadd.s32 4294967294, %s1518_s12   ;;  %s1518_s12 = sphi %s1565_s12, %s2442_s12   ;;  %s1514_s11 = sphi %s1563_s11, %s2441_s11   ;;  %s1510_s10 = sphi %s1561_s10, %s2440_s10   ;;  %s1506_s9 = sphi %s1559_s9, %s2439_s9  }
   0x7   : > { %p39_p0 = scmp.ne.s32.totalorder %s1510_s10, %s1506_s9  ;;  %p2396_p1 = scmp.eq.s32.totalorder %s1580_s13, 0 }
   0x8   : > { %p90_p3 = scmp.eq.s32.totalorder %s1229_s14, 1  ;;  %p1230_p5 = scmp.ge.s32.totalorder %s1518_s12, 1 }
   0x9   : > { %p1589_p4 = por %p2396_p1, %p39_p0  ;;  %p97_p7 = scmp.lt.s32.totalorder %s1518_s12, 3 }
   0xa   : > { %p1594_p6 = por %p90_p3, %p39_p0  ;;  %s1520_s18 = smov [#allocation6]  }
   0xb   : > { %s2408_s15 = scalar_select %p1589_p4, 1, 0 }
   0xc   : > { %s2409_s16 = scalar_select %p1594_p6, 1, 0 }
   0xd   : > { %p1599_p8 = pnand %p1230_p5, %p97_p7  ;;  %s109_s19 = sshll.u32 %s1520_s18, 4  ;;  %s1603_s19 = int_to_ptr.vmem [resolvable:$true] %s109_s19 }
   0xe   : > { %s1615_s21 = sadd.s32 1, %s1518_s12   ;;  %s26_s22 = sadd.s32 1, %s1514_s11 }
   0xf   : > { %s2410_s17 = scalar_select %p1599_p8, 1, 0 }
  0x10   : > { %p1296_p9 = pneg %p1599_p8  ;;  %s23_s23 = ssub.s32 %s1518_s12, %s1615_s21 }
  0x11   : > { %s1390_s26 = scalar_lea.hbm %s2394_s1, 896 }
  0x12   : > { %p1610_p11 = pnand %p1296_p9, %p2396_p1  ;;  %p1391_p12 = scmp.ne.s32.totalorder %s2394_s1, %s1390_s26 }
  0x13   : > { %p1397_p5 = scmp.lt.u32.totalorder %s1390_s26, %s2394_s1 }
  0x14   : > { %p1392_p13 = pneg %p1610_p11 }
  0x16   : > { %p1393_p0 = pnand %p1392_p13, %p1391_p12 }
  0x18   : > { %p1394_p3 = pneg %p1393_p0 }
  0x1a   : > { %p1399_p7 = pnand %p1397_p5, %p1394_p3 }
  0x1c   : > { %1402 = shalt.err (!%p1399_p7)
}
  0x1d   : > { %s1403_s3 = scalar_lea.vmem %s1603_s19, 896  ;;  %p1411_p2 = scmp.lt.s32.totalorder %s1603_s19, %s1603_s19 }
  0x1e   : > { %p1404_p9 = scmp.ne.s32.totalorder %s1603_s19, %s1403_s3  ;;  %p1412_p6 = scmp.lt.s32.totalorder %s1403_s3, %s1403_s3 }
  0x20   : > { %p1406_p10 = pnand %p1404_p9, %p1392_p13  ;;  %p1413_p4 = por %p1412_p6, %p1411_p2 }
  0x22   : > { %p1407_p1 = pneg %p1406_p10 }
  0x24   : > { %p1414_p8 = pnand %p1413_p4, %p1407_p1 }
  0x26   : > { %1417 = shalt.err (!%p1414_p8)
}
  0x27   : > { %s1521_s4 = smov 448   ;;  %s1522_s5 = smov 28  }
  0x28   : > { %1299 = dma.hbm_to_vmem [thread:$0]  (!%p1610_p11), %s2394_s1, 896, %s1603_s19, [#allocation7], %s1521_s4, %s1521_s4, %s1522_s5  }
  0x29   : > { %p24_p2 = scmp.eq.s32.totalorder %s23_s23, 0  ;;  %p33_p1 = scmp.ne.s32.totalorder %s1514_s11, %s1510_s10 }
  0x2a   : > { %p34_p4 = scmp.eq.s32.totalorder %s1518_s12, 0  ;;  %p1309_p6 = scmp.lt.s32.totalorder %s1518_s12, 2 }
  0x2b   : > { %s1646_s8 = scalar_select %p24_p2, %s1514_s11, %s26_s22  }
  0x2c   : > { %p35_p8 = por %p34_p4, %p33_p1  ;;  %p2412_p10 = scmp.eq.s32.totalorder %s1580_s13, 1 }
  0x2d   : > { %s123_s18 = sand.u32 1, %s1514_s11   ;;  %s1286_s24 = smul.u32 1280, %s1518_s12 }
  0x2e   : > { %p1650_p12 = por %p2412_p10, %p33_p1  ;;  %s1285_s25 = smul.u32 80, %s123_s18 }
  0x2f   : > { %s1659_s27 = scalar_lea.hbm %s2393_s0, %s1286_s24  ;;  %p1661_p11 = pnand %p1309_p6, %p35_p8 }
  0x30   : > { %s127_s22 = scalar_lea.vmem [#allocation3], %s1285_s25  ;;  %s1667_s28 = scalar_lea.sflag [#allocation4], %s123_s18 }
  0x31   : > { %s135_s23 = sshll.u32 %s127_s22, 4  ;;  %s1418_s29 = scalar_lea.hbm %s1659_s27, 1280  ;;  %s1665_s23 = int_to_ptr.vmem [resolvable:$true] %s135_s23 }
  0x32   : > { %p1419_p13 = scmp.ne.s32.totalorder %s1659_s27, %s1418_s29  ;;  %p1420_p0 = pneg %p1661_p11 }
  0x33   : > { %s1423_s4 = scalar_lea.hbm %s2393_s0, 2560  ;;  %p1424_p7 = scmp.lt.u32.totalorder %s1659_s27, %s2393_s0 }
  0x34   : > { %p1421_p3 = pnand %p1420_p0, %p1419_p13  ;;  %p1425_p9 = scmp.lt.u32.totalorder %s1423_s4, %s1418_s29 }
  0x35   : > { %p1427_p1 = scmp.lt.u32.totalorder %s1418_s29, %s1659_s27 }
  0x36   : > { %p1422_p5 = pneg %p1421_p3  ;;  %p1426_p2 = por %p1425_p9, %p1424_p7 }
  0x38   : > { %p1428_p4 = por %p1427_p1, %p1426_p2 }
  0x3a   : > { %p1429_p6 = pnand %p1428_p4, %p1422_p5 }
  0x3c   : > { %1432 = shalt.err (!%p1429_p6)
}
  0x3d   : > { %s1433_s7 = scalar_lea.vmem %s1665_s23, 1280  ;;  %s1523_s18 = smov [#allocation3]  }
  0x3e   : > { %p1434_p8 = scmp.ne.s32.totalorder %s1665_s23, %s1433_s7  ;;  %s1438_s24 = sshll.u32 %s1523_s18, 4  ;;  %s1439_s24 = int_to_ptr.vmem [resolvable:$false] %s1438_s24 }
  0x3f   : > { %s1440_s25 = scalar_lea.vmem %s1439_s24, 2560  ;;  %p1441_p3 = scmp.lt.s32.totalorder %s1665_s23, %s1439_s24 }
  0x40   : > { %p1436_p10 = pnand %p1434_p8, %p1420_p0  ;;  %p1442_p7 = scmp.lt.s32.totalorder %s1440_s25, %s1433_s7 }
  0x42   : > { %p1437_p13 = pneg %p1436_p10  ;;  %p1443_p9 = por %p1442_p7, %p1441_p3 }
  0x44   : > { %p1444_p2 = pnand %p1443_p9, %p1437_p13 }
  0x46   : > { %1447 = shalt.err (!%p1444_p2)
}
  0x47   : > { %s1524_s20 = smov 320   ;;  %s1525_s26 = smov 20  }
  0x48   : > { %1303 = dma.hbm_to_vmem [thread:$0]  (!%p1661_p11), %s1659_s27, 1280, %s1665_s23, %s1667_s28, %s1524_s20, %s1524_s20, %s1525_s26  }
  0x49   : > { %p2415_p0 = scmp.ne.s32.totalorder %s2410_s17, 0 }
  0x4b   : > { %147 = sbr.rel (%p2415_p0) target bundleno = 687 (0x2af), region = 28 }
  0x52   : > { %s1698_s22 = sand.u32 1, %s1510_s10   ;;  %p2416_p5 = scmp.ne.s32.totalorder %s2408_s15, 0 }
  0x53   : > { %s1287_s29 = smul.u32 80, %s1698_s22  ;;  %s150_s30 = scalar_lea.sflag [#allocation4], %s1698_s22 }
  0x55   : > { %s1702_s3 = scalar_lea.vmem [#allocation3], %s1287_s29 }
  0x56   : > { %1493 = dma.done.wait (%p2416_p5), %s150_s30, 1280  }
  0x57   : > { %1495 = vsyncadd (%p2416_p5), %s150_s30, 4294966016  ;;  %p2417_p11 = scmp.eq.s32.totalorder %s1580_s13, 0 }
  0x59   : > { %1497 = dma.done.wait (%p2417_p11), [#allocation7], 896   ;;  %p2418_p1 = pmov %p2417_p11 }
  0x5a   : > { %v1713_v0 = vld [vmem:[%s1702_s3 + $0x2c] ss:$20 sps:$4 sm:$0xff]   ;;  %v1716_v1 = vld [vmem:[%s1702_s3 + $0x4] ss:$20 sps:$4 sm:$0xff]   ;;  %s1526_s17 = smov 120   ;;  %s1527_s15 = smov 112  }
  0x5b   : > { %1499 = vsyncadd (%p2418_p1), [#allocation7], 4294966400  ;;  %529 = vrot.lane.b32.xlu0 %v1713_v0, %s1526_s17  ;;  %v1721_v2 = vld [vmem:[%s1702_s3 + $0x30] ss:$20 sps:$4 sm:$0xff]   ;;  %875 = vmatprep.subr.bf16.mxu1 %v1713_v0  ;;  %v1727_v3 = vld [vmem:[%s1702_s3 + $0x8] ss:$20 sps:$4 sm:$0xff]  }
  0x5c   : > { %213 = vrot.lane.b32.xlu1 %v1716_v1, %s1526_s17  ;;  %876 = vmatpush1.bf16.msra.mxu1 %v1716_v1  ;;  %s1528_s27 = smov 104   ;;  %s1529_s19 = smov 96   ;;  %v1831_v4 = vld [vmem:[%s1702_s3 + $0x34] ss:$20 sps:$4 sm:$0xff]   ;;  %v1840_v5 = vld [vmem:[%s1702_s3 + $0xc] ss:$20 sps:$4 sm:$0xff]  }
  0x5d   : > { %1015 = vmatprep.subr.bf16.mxu0 %v1721_v2  ;;  %s1530_s23 = smov 88   ;;  %s1531_s28 = smov 80   ;;  %2419 = vst [vmem:[#allocation12_spill] sm:$0xff] %v1840_v5  ;;  %vm215_vm0 = vcmask 982016   ;;  %v1382_v8 = vld [vmem:[#allocation6 + $0xc] ss:$28 sps:$4 sm:$0xff]  }
  0x5e   : > { %1016 = vmatpush1.bf16.msra.mxu0 %v1727_v3  ;;  %s1532_s4 = smov 72   ;;  %s1533_s5 = smov 64   ;;  %907 = vmatprep.mubr.bf16.mxu1 %v1382_v8  ;;  %vm243_vm1 = vcmask 916480   ;;  %v1893_v19 = vld [vmem:[%s1702_s3 + $0x28] ss:$20 sps:$4 sm:$0xff]   ;;  %vm266_vm2 = vcmask 850944  }
  0x5f   : > { %534 = vrot.lane.b32.xlu0 %v1721_v2, %s1526_s17  ;;  %s1534_s6 = smov 56   ;;  %s1535_s7 = smov 48   ;;  %v1907_v23 = vld [vmem:[%s1702_s3] ss:$20 sps:$4 sm:$0xff]   ;;  %vm284_vm3 = vcmask 785408   ;;  %vm302_vm4 = vcmask 719872  }
  0x60   : > { %219 = vrot.lane.b32.xlu1 %v1727_v3, %s1526_s17  ;;  %s1536_s18 = smov 40   ;;  %s1537_s24 = smov 32   ;;  %vm320_vm5 = vcmask 654336   ;;  %vm338_vm6 = vcmask 588800   ;;  %vm356_vm7 = vcmask 523264   ;;  %vm374_vm8 = vcmask 457728  }
  0x61   : > { %s1538_s25 = smov 24   ;;  %s1539_s20 = smov 16   ;;  %vm392_vm9 = vcmask 392192   ;;  %vm410_vm10 = vcmask 326656   ;;  %vm428_vm11 = vcmask 261120   ;;  %vm446_vm12 = vcmask 195584  }
  0x62   : > { %s1540_s26 = smov 8   ;;  %vm464_vm13 = vcmask 130048   ;;  %vm482_vm14 = vcmask 64512   ;;  %s1238_s29 = sshll.u32 %s1698_s22, 5 }
  0x63   : > { %556 = vrot.lane.b32.xlu0 %v1713_v0, %s1527_s15  ;;  %s177_s30 = scalar_lea.vmem [#allocation8], %s1238_s29 }
  0x64   : > { %561 = vrot.lane.b32.xlu1 %v1721_v2, %s1527_s15 }
  0x67   : > { %241 = vrot.lane.b32.xlu0 %v1716_v1, %s1527_s15 }
  0x68   : > { %247 = vrot.lane.b32.xlu1 %v1727_v3, %s1527_s15 }
  0x6b   : > { %578 = vrot.lane.b32.xlu0 %v1713_v0, %s1528_s27 }
  0x6c   : > { %583 = vrot.lane.b32.xlu1 %v1721_v2, %s1528_s27 }
  0x6f   : > { %264 = vrot.lane.b32.xlu0 %v1716_v1, %s1528_s27 }
  0x70   : > { %270 = vrot.lane.b32.xlu1 %v1727_v3, %s1528_s27 }
  0x73   : > { %595 = vrot.lane.b32.xlu0 %v1713_v0, %s1529_s19 }
  0x74   : > { %600 = vrot.lane.b32.xlu1 %v1721_v2, %s1529_s19 }
  0x77   : > { %282 = vrot.lane.b32.xlu0 %v1716_v1, %s1529_s19 }
  0x78   : > { %288 = vrot.lane.b32.xlu1 %v1727_v3, %s1529_s19 }
  0x7b   : > { %612 = vrot.lane.b32.xlu0 %v1713_v0, %s1530_s23 }
  0x7c   : > { %617 = vrot.lane.b32.xlu1 %v1721_v2, %s1530_s23 }
  0x7f   : > { %300 = vrot.lane.b32.xlu0 %v1716_v1, %s1530_s23 }
  0x80   : > { %306 = vrot.lane.b32.xlu1 %v1727_v3, %s1530_s23 }
  0x83   : > { %629 = vrot.lane.b32.xlu0 %v1713_v0, %s1531_s28 }
  0x84   : > { %634 = vrot.lane.b32.xlu1 %v1721_v2, %s1531_s28 }
  0x87   : > { %318 = vrot.lane.b32.xlu0 %v1716_v1, %s1531_s28 }
  0x88   : > { %324 = vrot.lane.b32.xlu1 %v1727_v3, %s1531_s28 }
  0x8b   : > { %646 = vrot.lane.b32.xlu0 %v1713_v0, %s1532_s4 }
  0x8c   : > { %651 = vrot.lane.b32.xlu1 %v1721_v2, %s1532_s4 }
  0x8f   : > { %336 = vrot.lane.b32.xlu0 %v1716_v1, %s1532_s4 }
  0x90   : > { %342 = vrot.lane.b32.xlu1 %v1727_v3, %s1532_s4 }
  0x93   : > { %663 = vrot.lane.b32.xlu0 %v1713_v0, %s1533_s5 }
  0x94   : > { %668 = vrot.lane.b32.xlu1 %v1721_v2, %s1533_s5 }
  0x97   : > { %354 = vrot.lane.b32.xlu0 %v1716_v1, %s1533_s5 }
  0x98   : > { %360 = vrot.lane.b32.xlu1 %v1727_v3, %s1533_s5 }
  0x9b   : > { %680 = vrot.lane.b32.xlu0 %v1713_v0, %s1534_s6 }
  0x9c   : > { %685 = vrot.lane.b32.xlu1 %v1721_v2, %s1534_s6 }
  0x9f   : > { %372 = vrot.lane.b32.xlu0 %v1716_v1, %s1534_s6 }
  0xa0   : > { %378 = vrot.lane.b32.xlu1 %v1727_v3, %s1534_s6 }
  0xa3   : > { %697 = vrot.lane.b32.xlu0 %v1713_v0, %s1535_s7 }
  0xa4   : > { %702 = vrot.lane.b32.xlu1 %v1721_v2, %s1535_s7 }
  0xa7   : > { %390 = vrot.lane.b32.xlu0 %v1716_v1, %s1535_s7 }
  0xa8   : > { %396 = vrot.lane.b32.xlu1 %v1727_v3, %s1535_s7 }
  0xab   : > { %714 = vrot.lane.b32.xlu0 %v1713_v0, %s1536_s18 }
  0xac   : > { %719 = vrot.lane.b32.xlu1 %v1721_v2, %s1536_s18 }
  0xaf   : > { %408 = vrot.lane.b32.xlu0 %v1716_v1, %s1536_s18 }
  0xb0   : > { %414 = vrot.lane.b32.xlu1 %v1727_v3, %s1536_s18 }
  0xb3   : > { %731 = vrot.lane.b32.xlu0 %v1713_v0, %s1537_s24 }
  0xb4   : > { %736 = vrot.lane.b32.xlu1 %v1721_v2, %s1537_s24 }
  0xb7   : > { %426 = vrot.lane.b32.xlu0 %v1716_v1, %s1537_s24 }
  0xb8   : > { %432 = vrot.lane.b32.xlu1 %v1727_v3, %s1537_s24 }
  0xbb   : > { %748 = vrot.lane.b32.xlu0 %v1713_v0, %s1538_s25 }
  0xbc   : > { %753 = vrot.lane.b32.xlu1 %v1721_v2, %s1538_s25 }
  0xbf   : > { %444 = vrot.lane.b32.xlu0 %v1716_v1, %s1538_s25 }
  0xc0   : > { %450 = vrot.lane.b32.xlu1 %v1727_v3, %s1538_s25 }
  0xc3   : > { %539 = vrot.lane.b32.xlu0 %v1831_v4, %s1526_s17 }
  0xc4   : > { %765 = vrot.lane.b32.xlu1 %v1713_v0, %s1539_s20 }
  0xc7   : > { %770 = vrot.lane.b32.xlu0 %v1721_v2, %s1539_s20 }
  0xc8   : > { %224 = vrot.lane.b32.xlu1 %v1840_v5, %s1526_s17 }
  0xcb   : > { %462 = vrot.lane.b32.xlu0 %v1716_v1, %s1539_s20 }
  0xcc   : > { %468 = vrot.lane.b32.xlu1 %v1727_v3, %s1539_s20 }
  0xcd   : > { %v1850_v6 = vpop.permute.xlu0 %529 }
  0xce   : > { %v1852_v7 = vpop.permute.xlu1 %213 }
  0xcf   : > { %566 = vrot.lane.b32.xlu0 %v1831_v4, %s1527_s15 }
  0xd0   : > { %782 = vrot.lane.b32.xlu1 %v1713_v0, %s1540_s26 }
  0xd1   : > { %v1858_v9 = vpop.permute.xlu0 %534 }
  0xd2   : > { %v1860_v10 = vpop.permute.xlu1 %219  ;;  %v536_v11 = vsel %vm215_vm0, %v1850_v6, %v1858_v9 }
  0xd3   : > { %787 = vrot.lane.b32.xlu0 %v1721_v2, %s1540_s26  ;;  %877 = vmatprep.subr.bf16.mxu1 %v536_v11  ;;  %v221_v12 = vsel %vm215_vm0, %v1852_v7, %v1860_v10 }
  0xd4   : > { %252 = vrot.lane.b32.xlu1 %v1840_v5, %s1527_s15  ;;  %878 = vmatpush1.bf16.msra.mxu1 %v221_v12 }
  0xd5   : > { %v1872_v13 = vpop.permute.xlu0 %556 }
  0xd6   : > { %v1874_v14 = vpop.permute.xlu1 %561 }
  0xd7   : > { %480 = vrot.lane.b32.xlu0 %v1716_v1, %s1540_s26  ;;  %v563_v15 = vsel %vm243_vm1, %v1872_v13, %v1874_v14 }
  0xd8   : > { %486 = vrot.lane.b32.xlu1 %v1727_v3, %s1540_s26  ;;  %879 = vmatprep.subr.bf16.mxu1 %v563_v15 }
  0xd9   : > { %v1883_v16 = vpop.permute.xlu0 %241 }
  0xda   : > { %v1885_v17 = vpop.permute.xlu1 %247 }
  0xdb   : > { %588 = vrot.lane.b32.xlu0 %v1831_v4, %s1528_s27  ;;  %v249_v18 = vsel %vm243_vm1, %v1883_v16, %v1885_v17 }
  0xdc   : > { %275 = vrot.lane.b32.xlu1 %v1840_v5, %s1528_s27  ;;  %880 = vmatpush1.bf16.msra.mxu1 %v249_v18 }
  0xdd   : > { %v1897_v20 = vpop.permute.xlu0 %578 }
  0xde   : > { %v1899_v21 = vpop.permute.xlu1 %583 }
  0xdf   : > { %527 = vrot.lane.b32.xlu0 %v1893_v19, %s1526_s17  ;;  %v585_v22 = vsel %vm266_vm2, %v1897_v20, %v1899_v21 }
  0xe0   : > { %605 = vrot.lane.b32.xlu1 %v1831_v4, %s1529_s19  ;;  %881 = vmatprep.subr.bf16.mxu1 %v585_v22 }
  0xe1   : > { %v1911_v24 = vpop.permute.xlu0 %264 }
  0xe2   : > { %v1913_v25 = vpop.permute.xlu1 %270 }
  0xe3   : > { %v272_v26 = vsel %vm266_vm2, %v1911_v24, %v1913_v25  ;;  %211 = vrot.lane.b32.xlu0 %v1907_v23, %s1526_s17 }
  0xe4   : > { %293 = vrot.lane.b32.xlu1 %v1840_v5, %s1529_s19  ;;  %882 = vmatpush1.bf16.msra.mxu1 %v272_v26 }
  0xe5   : > { %v1922_v27 = vpop.permute.xlu0 %595 }
  0xe6   : > { %v1924_v28 = vpop.permute.xlu1 %600 }
  0xe7   : > { %v602_v29 = vsel %vm284_vm3, %v1922_v27, %v1924_v28  ;;  %554 = vrot.lane.b32.xlu0 %v1893_v19, %s1527_s15 }
  0xe8   : > { %622 = vrot.lane.b32.xlu1 %v1831_v4, %s1530_s23  ;;  %883 = vmatprep.subr.bf16.mxu1 %v602_v29 }
  0xe9   : > { %v1933_v30 = vpop.permute.xlu0 %282 }
  0xea   : > { %v1935_v31 = vpop.permute.xlu1 %288 }
  0xeb   : > { %v290_v32 = vsel %vm284_vm3, %v1933_v30, %v1935_v31  ;;  %239 = vrot.lane.b32.xlu0 %v1907_v23, %s1527_s15 }
  0xec   : > { %311 = vrot.lane.b32.xlu1 %v1840_v5, %s1530_s23  ;;  %884 = vmatpush1.bf16.msra.mxu1 %v290_v32 }
  0xed   : > { %v1944_v33 = vpop.permute.xlu0 %612 }
  0xee   : > { %v1946_v34 = vpop.permute.xlu1 %617 }
  0xef   : > { %v619_v35 = vsel %vm302_vm4, %v1944_v33, %v1946_v34  ;;  %576 = vrot.lane.b32.xlu0 %v1893_v19, %s1528_s27 }
  0xf0   : > { %639 = vrot.lane.b32.xlu1 %v1831_v4, %s1531_s28  ;;  %885 = vmatprep.subr.bf16.mxu1 %v619_v35 }
  0xf1   : > { %v1955_v36 = vpop.permute.xlu0 %300 }
  0xf2   : > { %v1957_v37 = vpop.permute.xlu1 %306 }
  0xf3   : > { %v308_v38 = vsel %vm302_vm4, %v1955_v36, %v1957_v37  ;;  %262 = vrot.lane.b32.xlu0 %v1907_v23, %s1528_s27 }
  0xf4   : > { %329 = vrot.lane.b32.xlu1 %v1840_v5, %s1531_s28  ;;  %886 = vmatpush1.bf16.msra.mxu1 %v308_v38 }
  0xf5   : > { %v1966_v39 = vpop.permute.xlu0 %629 }
  0xf6   : > { %v1968_v40 = vpop.permute.xlu1 %634 }
  0xf7   : > { %v636_v41 = vsel %vm320_vm5, %v1966_v39, %v1968_v40  ;;  %593 = vrot.lane.b32.xlu0 %v1893_v19, %s1529_s19 }
  0xf8   : > { %656 = vrot.lane.b32.xlu1 %v1831_v4, %s1532_s4  ;;  %887 = vmatprep.subr.bf16.mxu1 %v636_v41 }
  0xf9   : > { %v1977_v42 = vpop.permute.xlu0 %318 }
  0xfa   : > { %v1979_v43 = vpop.permute.xlu1 %324 }
  0xfb   : > { %v326_v44 = vsel %vm320_vm5, %v1977_v42, %v1979_v43  ;;  %280 = vrot.lane.b32.xlu0 %v1907_v23, %s1529_s19 }
  0xfc   : > { %347 = vrot.lane.b32.xlu1 %v1840_v5, %s1532_s4  ;;  %888 = vmatpush1.bf16.msra.mxu1 %v326_v44 }
  0xfd   : > { %v1988_v45 = vpop.permute.xlu0 %646 }
  0xfe   : > { %v1990_v46 = vpop.permute.xlu1 %651 }
  0xff   : > { %v653_v47 = vsel %vm338_vm6, %v1988_v45, %v1990_v46  ;;  %610 = vrot.lane.b32.xlu0 %v1893_v19, %s1530_s23 }
 0x100   : > { %673 = vrot.lane.b32.xlu1 %v1831_v4, %s1533_s5  ;;  %889 = vmatprep.subr.bf16.mxu1 %v653_v47 }
 0x101   : > { %v1999_v48 = vpop.permute.xlu0 %336 }
 0x102   : > { %v2001_v49 = vpop.permute.xlu1 %342 }
 0x103   : > { %v344_v50 = vsel %vm338_vm6, %v1999_v48, %v2001_v49  ;;  %298 = vrot.lane.b32.xlu0 %v1907_v23, %s1530_s23 }
 0x104   : > { %365 = vrot.lane.b32.xlu1 %v1840_v5, %s1533_s5  ;;  %890 = vmatpush1.bf16.msra.mxu1 %v344_v50 }
 0x105   : > { %v2010_v51 = vpop.permute.xlu0 %663 }
 0x106   : > { %v2012_v52 = vpop.permute.xlu1 %668 }
 0x107   : > { %v670_v53 = vsel %vm356_vm7, %v2010_v51, %v2012_v52  ;;  %627 = vrot.lane.b32.xlu0 %v1893_v19, %s1531_s28 }
 0x108   : > { %690 = vrot.lane.b32.xlu1 %v1831_v4, %s1534_s6  ;;  %891 = vmatprep.subr.bf16.mxu1 %v670_v53 }
 0x109   : > { %v2021_v54 = vpop.permute.xlu0 %354 }
 0x10a   : > { %v2023_v55 = vpop.permute.xlu1 %360 }
 0x10b   : > { %v362_v56 = vsel %vm356_vm7, %v2021_v54, %v2023_v55  ;;  %316 = vrot.lane.b32.xlu0 %v1907_v23, %s1531_s28  ;;  %s1542_s28 = smov [#allocation8]  }
 0x10c   : > { %383 = vrot.lane.b32.xlu1 %v1840_v5, %s1534_s6  ;;  %892 = vmatpush1.bf16.msra.mxu1 %v362_v56 }
 0x10d   : > { %v2032_v57 = vpop.permute.xlu0 %680 }
 0x10e   : > { %v2034_v58 = vpop.permute.xlu1 %685 }
 0x10f   : > { %v687_v59 = vsel %vm374_vm8, %v2032_v57, %v2034_v58  ;;  %644 = vrot.lane.b32.xlu0 %v1893_v19, %s1532_s4 }
 0x110   : > { %707 = vrot.lane.b32.xlu1 %v1831_v4, %s1535_s7  ;;  %893 = vmatprep.subr.bf16.mxu1 %v687_v59 }
 0x111   : > { %v2043_v60 = vpop.permute.xlu0 %372 }
 0x112   : > { %v2045_v61 = vpop.permute.xlu1 %378 }
 0x113   : > { %v380_v62 = vsel %vm374_vm8, %v2043_v60, %v2045_v61  ;;  %334 = vrot.lane.b32.xlu0 %v1907_v23, %s1532_s4  ;;  %s1452_s4 = sshll.u32 %s1542_s28, 4  ;;  %s1453_s4 = int_to_ptr.vmem [resolvable:$false] %s1452_s4 }
 0x114   : > { %401 = vrot.lane.b32.xlu1 %v1840_v5, %s1535_s7  ;;  %894 = vmatpush1.bf16.msra.mxu1 %v380_v62 }
 0x115   : > { %v2054_v63 = vpop.permute.xlu0 %697 }
 0x116   : > { %v2056_v0 = vpop.permute.xlu1 %702 }
 0x117   : > { %v704_v1 = vsel %vm392_vm9, %v2054_v63, %v2056_v0  ;;  %661 = vrot.lane.b32.xlu0 %v1893_v19, %s1533_s5 }
 0x118   : > { %724 = vrot.lane.b32.xlu1 %v1831_v4, %s1536_s18  ;;  %895 = vmatprep.subr.bf16.mxu1 %v704_v1  ;;  %v1385_v1 = vld [vmem:[#allocation6 + $0x14] ss:$28 sps:$4 sm:$0xff]  }
 0x119   : > { %v2065_v2 = vpop.permute.xlu0 %390  ;;  %1047 = vmatprep.mubr.bf16.mxu0 %v1385_v1 }
 0x11a   : > { %v2067_v3 = vpop.permute.xlu1 %396 }
 0x11b   : > { %v398_v8 = vsel %vm392_vm9, %v2065_v2, %v2067_v3  ;;  %352 = vrot.lane.b32.xlu0 %v1907_v23, %s1533_s5  ;;  %s1454_s5 = scalar_lea.vmem %s1453_s4, 1024 }
 0x11c   : > { %419 = vrot.lane.b32.xlu1 %v1840_v5, %s1536_s18  ;;  %896 = vmatpush1.bf16.msra.mxu1 %v398_v8 }
 0x11d   : > { %v2076_v11 = vpop.permute.xlu0 %714 }
 0x11e   : > { %v2078_v12 = vpop.permute.xlu1 %719 }
 0x11f   : > { %v721_v15 = vsel %vm410_vm10, %v2076_v11, %v2078_v12  ;;  %678 = vrot.lane.b32.xlu0 %v1893_v19, %s1534_s6 }
 0x120   : > { %741 = vrot.lane.b32.xlu1 %v1831_v4, %s1537_s24  ;;  %897 = vmatprep.subr.bf16.mxu1 %v721_v15 }
 0x121   : > { %v2087_v18 = vpop.permute.xlu0 %408 }
 0x122   : > { %v2089_v22 = vpop.permute.xlu1 %414 }
 0x123   : > { %v416_v26 = vsel %vm410_vm10, %v2087_v18, %v2089_v22  ;;  %370 = vrot.lane.b32.xlu0 %v1907_v23, %s1534_s6 }
 0x124   : > { %437 = vrot.lane.b32.xlu1 %v1840_v5, %s1537_s24  ;;  %898 = vmatpush1.bf16.msra.mxu1 %v416_v26 }
 0x125   : > { %v2098_v29 = vpop.permute.xlu0 %731 }
 0x126   : > { %v2100_v32 = vpop.permute.xlu1 %736 }
 0x127   : > { %v738_v35 = vsel %vm428_vm11, %v2098_v29, %v2100_v32  ;;  %695 = vrot.lane.b32.xlu0 %v1893_v19, %s1535_s7 }
 0x128   : > { %758 = vrot.lane.b32.xlu1 %v1831_v4, %s1538_s25  ;;  %899 = vmatprep.subr.bf16.mxu1 %v738_v35 }
 0x129   : > { %v2109_v38 = vpop.permute.xlu0 %426 }
 0x12a   : > { %v2111_v41 = vpop.permute.xlu1 %432 }
 0x12b   : > { %v434_v44 = vsel %vm428_vm11, %v2109_v38, %v2111_v41  ;;  %388 = vrot.lane.b32.xlu0 %v1907_v23, %s1535_s7 }
 0x12c   : > { %455 = vrot.lane.b32.xlu1 %v1840_v5, %s1538_s25  ;;  %900 = vmatpush1.bf16.msra.mxu1 %v434_v44 }
 0x12d   : > { %v2120_v47 = vpop.permute.xlu0 %748 }
 0x12e   : > { %v2122_v50 = vpop.permute.xlu1 %753 }
 0x12f   : > { %v755_v53 = vsel %vm446_vm12, %v2120_v47, %v2122_v50  ;;  %712 = vrot.lane.b32.xlu0 %v1893_v19, %s1536_s18 }
 0x130   : > { %775 = vrot.lane.b32.xlu1 %v1831_v4, %s1539_s20  ;;  %901 = vmatprep.subr.bf16.mxu1 %v755_v53 }
 0x131   : > { %v2131_v56 = vpop.permute.xlu0 %444 }
 0x132   : > { %v2133_v59 = vpop.permute.xlu1 %450 }
 0x133   : > { %v452_v62 = vsel %vm446_vm12, %v2131_v56, %v2133_v59  ;;  %406 = vrot.lane.b32.xlu0 %v1907_v23, %s1536_s18 }
 0x134   : > { %473 = vrot.lane.b32.xlu1 %v1840_v5, %s1539_s20  ;;  %902 = vmatpush1.bf16.msra.mxu1 %v452_v62 }
 0x135   : > { %v2142_v8 = vpop.permute.xlu0 %539 }
 0x136   : > { %2420 = vst [vmem:[#allocation13_spill] sm:$0xff] %v2142_v8  ;;  %v2144_v15 = vpop.permute.xlu1 %765  ;;  %v541_v26 = vsel %vm215_vm0, %v1858_v9, %v2142_v8 }
 0x137   : > { %2421 = vst [vmem:[#allocation14_spill] sm:$0xff] %v2144_v15  ;;  %1017 = vmatprep.subr.bf16.mxu0 %v541_v26  ;;  %729 = vrot.lane.b32.xlu0 %v1893_v19, %s1537_s24 }
 0x138   : > { %792 = vrot.lane.b32.xlu1 %v1831_v4, %s1540_s26 }
 0x139   : > { %v2153_v35 = vpop.permute.xlu0 %770 }
 0x13a   : > { %v2155_v44 = vpop.permute.xlu1 %224  ;;  %v772_v53 = vsel %vm464_vm13, %v2144_v15, %v2153_v35 }
 0x13b   : > { %2422 = vst [vmem:[#allocation15_spill] sm:$0xff] %v2155_v44  ;;  %903 = vmatprep.subr.bf16.mxu1 %v772_v53  ;;  %v226_v9 = vsel %vm215_vm0, %v1860_v10, %v2155_v44  ;;  %424 = vrot.lane.b32.xlu0 %v1907_v23, %s1537_s24  ;;  %v1378_v10 = vld [vmem:[%s1702_s3 + $0x38] ss:$20 sps:$4 sm:$0xff]  }
 0x13c   : > { %491 = vrot.lane.b32.xlu1 %v1840_v5, %s1540_s26  ;;  %1018 = vmatpush1.bf16.msra.mxu0 %v226_v9 }
 0x13d   : > { %v2167_v62 = vpop.permute.xlu0 %462 }
 0x13e   : > { %2423 = vst [vmem:[#allocation16_spill] sm:$0xff] %v2167_v62  ;;  %v2169_v1 = vpop.permute.xlu1 %468 }
 0x13f   : > { %v470_v26 = vsel %vm464_vm13, %v2167_v62, %v2169_v1  ;;  %746 = vrot.lane.b32.xlu0 %v1893_v19, %s1538_s25  ;;  %v1379_v62 = vld [vmem:[%s1702_s3 + $0x10] ss:$20 sps:$4 sm:$0xff]   ;;  %s1146_s3 = sshll.u32 %s177_s30, 4  ;;  %s2343_s3 = int_to_ptr.vmem [resolvable:$true] %s1146_s3 }
 0x140   : > { %904 = vmatpush1.bf16.msra.mxu1 %v470_v26  ;;  %442 = vrot.lane.b32.xlu1 %v1907_v23, %s1538_s25  ;;  %s1448_s23 = scalar_lea.vmem %s2343_s3, 512  ;;  %p1455_p10 = scmp.lt.s32.totalorder %s2343_s3, %s1453_s4 }
 0x141   : > { %v2179_v53 = vpop.permute.xlu0 %566  ;;  %p1449_p4 = scmp.ne.s32.totalorder %s2343_s3, %s1448_s23  ;;  %p1456_p13 = scmp.lt.s32.totalorder %s1454_s5, %s1448_s23 }
 0x142   : > { %2424 = vst [vmem:[#allocation17_spill] sm:$0xff] %v2179_v53  ;;  %v2181_v44 = vpop.permute.xlu1 %782  ;;  %v568_v9 = vsel %vm243_vm1, %v1874_v14, %v2179_v53 }
 0x143   : > { %2425 = vst [vmem:[#allocation18_spill] sm:$0xff] %v2181_v44  ;;  %1019 = vmatprep.subr.bf16.mxu0 %v568_v9  ;;  %549 = vrot.lane.b32.xlu0 %v1378_v10, %s1526_s17  ;;  %p1450_p6 = pnand %p1449_p4, %p1650_p12  ;;  %p1457_p3 = por %p1456_p13, %p1455_p10 }
 0x144   : > { %763 = vrot.lane.b32.xlu1 %v1893_v19, %s1539_s20 }
 0x145   : > { %v2190_v26 = vpop.permute.xlu0 %787  ;;  %p1451_p8 = pneg %p1450_p6 }
 0x146   : > { %v2192_v15 = vpop.permute.xlu1 %252  ;;  %v789_v8 = vsel %vm482_vm14, %v2181_v44, %v2190_v26  ;;  %v1388_v44 = vld [vmem:[#allocation6 + $0x4] ss:$28 sps:$4 sm:$0xff]  }
 0x147   : > { %2426 = vst [vmem:[#allocation19_spill] sm:$0xff] %v2192_v15  ;;  %905 = vmatprep.subr.bf16.mxu1 %v789_v8  ;;  %v254_v14 = vsel %vm243_vm1, %v1885_v17, %v2192_v15  ;;  %234 = vrot.lane.b32.xlu0 %v1379_v62, %s1526_s17  ;;  %v1380_v8 = vld [vmem:[#allocation6 + $0x8] ss:$28 sps:$4 sm:$0xff]   ;;  %s1272_s17 = sshll.u32 %s1580_s13, 9  ;;  %s1132_s13 = scalar_lea.sflag [#allocation5], %s1698_s22 }
 0x148   : > { %1020 = vmatpush1.bf16.msra.mxu0 %v254_v14  ;;  %460 = vrot.lane.b32.xlu1 %v1907_v23, %s1539_s20  ;;  %s2348_s19 = scalar_lea.hbm %s2395_s2, %s1272_s17  ;;  %p1458_p7 = pnand %p1457_p3, %p1451_p8 }
 0x149   : > { %v2203_v9 = vpop.permute.xlu0 %480 }
 0x14a   : > { %2427 = vst [vmem:[#allocation20_spill] sm:$0xff] %v2203_v9  ;;  %v2205_v53 = vpop.permute.xlu1 %486 }
 0x14b   : > { %v488_v5 = vsel %vm482_vm14, %v2203_v9, %v2205_v53  ;;  %571 = vrot.lane.b32.xlu0 %v1378_v10, %s1527_s15 }
 0x14c   : > { %906 = vmatpush1.bf16.msra.mxu1 %v488_v5  ;;  %780 = vrot.lane.b32.xlu1 %v1893_v19, %s1540_s26 }
 0x14d   : > { %v589_v17 = vpop.permute.xlu0 %588  ;;  %928 = vmatprep.subr.bf16.mxu1 %v1893_v19 }
 0x14e   : > { %v276_v14 = vpop.permute.xlu1 %275  ;;  %v590_v15 = vsel %vm266_vm2, %v1899_v21, %v589_v17 }
 0x14f   : > { %1021 = vmatprep.subr.bf16.mxu0 %v590_v15  ;;  %257 = vrot.lane.b32.xlu0 %v1379_v62, %s1527_s15  ;;  %v277_v9 = vsel %vm266_vm2, %v1913_v25, %v276_v14 }
 0x150   : > { %478 = vrot.lane.b32.xlu1 %v1907_v23, %s1540_s26  ;;  %1022 = vmatpush1.bf16.msra.mxu0 %v277_v9 }
 0x151   : > { %v528_v5 = vpop.permute.xlu0 %527  ;;  %908 = vmatmul.mubr.bf16.vlgmr.msra.gmra.mrb[0].mxu1 %v1380_v8 }
 0x152   : > { %v606_v10 = vpop.permute.xlu1 %605  ;;  %929 = vmatpush1.bf16.msra.mxu1 %v1907_v23  ;;  %v531_v19 = vsel %vm215_vm0, %v528_v5, %v1850_v6  ;;  %960 = vmatprep.mubr.bf16.mxu1 %v1388_v44 }
 0x153   : > { %930 = vmatprep.subr.bf16.mxu1 %v531_v19  ;;  %v607_v21 = vsel %vm284_vm3, %v1924_v28, %v606_v10 }
 0x154   : > { %1023 = vmatprep.subr.bf16.mxu0 %v607_v21 }
 0x155   : > { %v212_v15 = vpop.permute.xlu0 %211 }
 0x156   : > { %v294_v25 = vpop.permute.xlu1 %293  ;;  %v216_v62 = vsel %vm215_vm0, %v212_v15, %v1852_v7 }
 0x157   : > { %931 = vmatpush1.bf16.msra.mxu1 %v216_v62  ;;  %v295_v9 = vsel %vm284_vm3, %v1935_v31, %v294_v25 }
 0x158   : > { %1024 = vmatpush1.bf16.msra.mxu0 %v295_v9 }
 0x159   : > { %v555_v23 = vpop.permute.xlu0 %554 }
 0x15a   : > { %v623_v17 = vpop.permute.xlu1 %622  ;;  %v558_v6 = vsel %vm243_vm1, %v555_v23, %v1872_v13 }
 0x15b   : > { %932 = vmatprep.subr.bf16.mxu1 %v558_v6  ;;  %v624_v28 = vsel %vm302_vm4, %v1946_v34, %v623_v17 }
 0x15c   : > { %1025 = vmatprep.subr.bf16.mxu0 %v624_v28 }
 0x15d   : > { %v240_v44 = vpop.permute.xlu0 %239 }
 0x15e   : > { %v312_v8 = vpop.permute.xlu1 %311  ;;  %v244_v7 = vsel %vm243_vm1, %v240_v44, %v1883_v16 }
 0x15f   : > { %933 = vmatpush1.bf16.msra.mxu1 %v244_v7  ;;  %v313_v31 = vsel %vm302_vm4, %v1957_v37, %v312_v8 }
 0x160   : > { %1026 = vmatpush1.bf16.msra.mxu0 %v313_v31 }
 0x161   : > { %v577_v14 = vpop.permute.xlu0 %576 }
 0x162   : > { %v640_v5 = vpop.permute.xlu1 %639  ;;  %v580_v13 = vsel %vm266_vm2, %v577_v14, %v1897_v20 }
 0x163   : > { %934 = vmatprep.subr.bf16.mxu1 %v580_v13  ;;  %v641_v34 = vsel %vm320_vm5, %v1968_v40, %v640_v5 }
 0x164   : > { %1027 = vmatprep.subr.bf16.mxu0 %v641_v34 }
 0x165   : > { %v263_v10 = vpop.permute.xlu0 %262 }
 0x166   : > { %v330_v19 = vpop.permute.xlu1 %329  ;;  %v267_v16 = vsel %vm266_vm2, %v263_v10, %v1911_v24 }
 0x167   : > { %935 = vmatpush1.bf16.msra.mxu1 %v267_v16  ;;  %v331_v37 = vsel %vm320_vm5, %v1979_v43, %v330_v19 }
 0x168   : > { %1028 = vmatpush1.bf16.msra.mxu0 %v331_v37 }
 0x169   : > { %v594_v21 = vpop.permute.xlu0 %593 }
 0x16a   : > { %v657_v15 = vpop.permute.xlu1 %656  ;;  %v597_v20 = vsel %vm284_vm3, %v594_v21, %v1922_v27 }
 0x16b   : > { %936 = vmatprep.subr.bf16.mxu1 %v597_v20  ;;  %v658_v40 = vsel %vm338_vm6, %v1990_v46, %v657_v15 }
 0x16c   : > { %1029 = vmatprep.subr.bf16.mxu0 %v658_v40 }
 0x16d   : > { %v281_v25 = vpop.permute.xlu0 %280 }
 0x16e   : > { %v348_v62 = vpop.permute.xlu1 %347  ;;  %v285_v24 = vsel %vm284_vm3, %v281_v25, %v1933_v30 }
 0x16f   : > { %937 = vmatpush1.bf16.msra.mxu1 %v285_v24  ;;  %v349_v43 = vsel %vm338_vm6, %v2001_v49, %v348_v62 }
 0x170   : > { %1030 = vmatpush1.bf16.msra.mxu0 %v349_v43 }
 0x171   : > { %v611_v9 = vpop.permute.xlu0 %610 }
 0x172   : > { %v674_v23 = vpop.permute.xlu1 %673  ;;  %v614_v27 = vsel %vm302_vm4, %v611_v9, %v1944_v33 }
 0x173   : > { %938 = vmatprep.subr.bf16.mxu1 %v614_v27  ;;  %v675_v46 = vsel %vm356_vm7, %v2012_v52, %v674_v23 }
 0x174   : > { %1031 = vmatprep.subr.bf16.mxu0 %v675_v46 }
 0x175   : > { %v299_v17 = vpop.permute.xlu0 %298 }
 0x176   : > { %v366_v6 = vpop.permute.xlu1 %365  ;;  %v303_v30 = vsel %vm302_vm4, %v299_v17, %v1955_v36 }
 0x177   : > { %939 = vmatpush1.bf16.msra.mxu1 %v303_v30  ;;  %v367_v49 = vsel %vm356_vm7, %v2023_v55, %v366_v6 }
 0x178   : > { %1032 = vmatpush1.bf16.msra.mxu0 %v367_v49  ;;  %v1383_v49 = vld [vmem:[#allocation6 + $0x10] ss:$28 sps:$4 sm:$0xff]  }
 0x179   : > { %v628_v28 = vpop.permute.xlu0 %627 }
 0x17a   : > { %v691_v44 = vpop.permute.xlu1 %690  ;;  %v631_v33 = vsel %vm320_vm5, %v628_v28, %v1966_v39 }
 0x17b   : > { %940 = vmatprep.subr.bf16.mxu1 %v631_v33  ;;  %v692_v52 = vsel %vm374_vm8, %v2034_v58, %v691_v44 }
 0x17c   : > { %1033 = vmatprep.subr.bf16.mxu0 %v692_v52  ;;  %v1541_v52 = vmov 0  }
 0x17d   : > { %v317_v8 = vpop.permute.xlu0 %316 }
 0x17e   : > { %v384_v7 = vpop.permute.xlu1 %383  ;;  %v321_v36 = vsel %vm320_vm5, %v317_v8, %v1977_v42  ;;  %v2429_v8 = vld [vmem:[#allocation13_spill] sm:$0xff] }
 0x17f   : > { %941 = vmatpush1.bf16.msra.mxu1 %v321_v36  ;;  %v385_v55 = vsel %vm374_vm8, %v2045_v61, %v384_v7 }
 0x180   : > { %1034 = vmatpush1.bf16.msra.mxu0 %v385_v55 }
 0x181   : > { %v645_v31 = vpop.permute.xlu0 %644 }
 0x182   : > { %v708_v14 = vpop.permute.xlu1 %707  ;;  %v648_v39 = vsel %vm338_vm6, %v645_v31, %v1988_v45 }
 0x183   : > { %942 = vmatprep.subr.bf16.mxu1 %v648_v39  ;;  %v709_v58 = vsel %vm392_vm9, %v2056_v0, %v708_v14  ;;  %v2432_v14 = vld [vmem:[#allocation16_spill] sm:$0xff] }
 0x184   : > { %1035 = vmatprep.subr.bf16.mxu0 %v709_v58 }
 0x185   : > { %v335_v5 = vpop.permute.xlu0 %334 }
 0x186   : > { %v402_v13 = vpop.permute.xlu1 %401  ;;  %v339_v42 = vsel %vm338_vm6, %v335_v5, %v1999_v48 }
 0x187   : > { %943 = vmatpush1.bf16.msra.mxu1 %v339_v42  ;;  %v403_v61 = vsel %vm392_vm9, %v2067_v3, %v402_v13  ;;  %v2433_v13 = vld [vmem:[#allocation17_spill] sm:$0xff] }
 0x188   : > { %1036 = vmatpush1.bf16.msra.mxu0 %v403_v61  ;;  %v2434_v61 = vld [vmem:[#allocation18_spill] sm:$0xff] }
 0x189   : > { %v662_v34 = vpop.permute.xlu0 %661 }
 0x18a   : > { %v725_v10 = vpop.permute.xlu1 %724  ;;  %v665_v45 = vsel %vm356_vm7, %v662_v34, %v2010_v51 }
 0x18b   : > { %944 = vmatprep.subr.bf16.mxu1 %v665_v45  ;;  %v726_v0 = vsel %vm410_vm10, %v2078_v12, %v725_v10 }
 0x18c   : > { %1037 = vmatprep.subr.bf16.mxu0 %v726_v0  ;;  %v2435_v0 = vld [vmem:[#allocation19_spill] sm:$0xff] }
 0x18d   : > { %v353_v19 = vpop.permute.xlu0 %352 }
 0x18e   : > { %v420_v16 = vpop.permute.xlu1 %419  ;;  %v357_v48 = vsel %vm356_vm7, %v353_v19, %v2021_v54 }
 0x18f   : > { %945 = vmatpush1.bf16.msra.mxu1 %v357_v48  ;;  %v421_v3 = vsel %vm410_vm10, %v2089_v22, %v420_v16  ;;  %v1389_v16 = vld [vmem:[#allocation6 + $0x18] ss:$28 sps:$4 sm:$0xff]  }
 0x190   : > { %1038 = vmatpush1.bf16.msra.mxu0 %v421_v3  ;;  %v2436_v48 = vld [vmem:[#allocation20_spill] sm:$0xff] }
 0x191   : > { %v679_v37 = vpop.permute.xlu0 %678 }
 0x192   : > { %v742_v21 = vpop.permute.xlu1 %741  ;;  %v682_v51 = vsel %vm374_vm8, %v679_v37, %v2032_v57  ;;  %v1386_v37 = vld [vmem:[#allocation6] ss:$28 sps:$4 sm:$0xff]  }
 0x193   : > { %946 = vmatprep.subr.bf16.mxu1 %v682_v51  ;;  %v743_v12 = vsel %vm428_vm11, %v2100_v32, %v742_v21 }
 0x194   : > { %1039 = vmatprep.subr.bf16.mxu0 %v743_v12 }
 0x195   : > { %v371_v15 = vpop.permute.xlu0 %370 }
 0x196   : > { %v438_v20 = vpop.permute.xlu1 %437  ;;  %v375_v54 = vsel %vm374_vm8, %v371_v15, %v2043_v60 }
 0x197   : > { %947 = vmatpush1.bf16.msra.mxu1 %v375_v54  ;;  %v439_v22 = vsel %vm428_vm11, %v2111_v41, %v438_v20 }
 0x198   : > { %1040 = vmatpush1.bf16.msra.mxu0 %v439_v22 }
 0x199   : > { %v696_v40 = vpop.permute.xlu0 %695 }
 0x19a   : > { %v759_v25 = vpop.permute.xlu1 %758  ;;  %v699_v57 = vsel %vm392_vm9, %v696_v40, %v2054_v63 }
 0x19b   : > { %948 = vmatprep.subr.bf16.mxu1 %v699_v57  ;;  %v760_v32 = vsel %vm446_vm12, %v2122_v50, %v759_v25 }
 0x19c   : > { %1041 = vmatprep.subr.bf16.mxu0 %v760_v32 }
 0x19d   : > { %v389_v62 = vpop.permute.xlu0 %388 }
 0x19e   : > { %v456_v24 = vpop.permute.xlu1 %455  ;;  %v393_v60 = vsel %vm392_vm9, %v389_v62, %v2065_v2 }
 0x19f   : > { %949 = vmatpush1.bf16.msra.mxu1 %v393_v60  ;;  %v457_v41 = vsel %vm446_vm12, %v2133_v59, %v456_v24 }
 0x1a0   : > { %1042 = vmatpush1.bf16.msra.mxu0 %v457_v41 }
 0x1a1   : > { %v713_v43 = vpop.permute.xlu0 %712 }
 0x1a2   : > { %v776_v9 = vpop.permute.xlu1 %775  ;;  %v716_v63 = vsel %vm410_vm10, %v713_v43, %v2076_v11 }
 0x1a3   : > { %950 = vmatprep.subr.bf16.mxu1 %v716_v63  ;;  %v777_v50 = vsel %vm464_vm13, %v2153_v35, %v776_v9 }
 0x1a4   : > { %1043 = vmatprep.subr.bf16.mxu0 %v777_v50 }
 0x1a5   : > { %v407_v23 = vpop.permute.xlu0 %406 }
 0x1a6   : > { %v474_v27 = vpop.permute.xlu1 %473  ;;  %v411_v2 = vsel %vm410_vm10, %v407_v23, %v2087_v18 }
 0x1a7   : > { %951 = vmatpush1.bf16.msra.mxu1 %v411_v2  ;;  %v475_v59 = vsel %vm464_vm13, %v2169_v1, %v474_v27 }
 0x1a8   : > { %1044 = vmatpush1.bf16.msra.mxu0 %v475_v59 }
 0x1a9   : > { %v730_v46 = vpop.permute.xlu0 %729 }
 0x1aa   : > { %v793_v17 = vpop.permute.xlu1 %792  ;;  %v733_v11 = vsel %vm428_vm11, %v730_v46, %v2098_v29 }
 0x1ab   : > { %952 = vmatprep.subr.bf16.mxu1 %v733_v11  ;;  %v794_v35 = vsel %vm482_vm14, %v2190_v26, %v793_v17 }
 0x1ac   : > { %1045 = vmatprep.subr.bf16.mxu0 %v794_v35 }
 0x1ad   : > { %v425_v6 = vpop.permute.xlu0 %424 }
 0x1ae   : > { %v492_v30 = vpop.permute.xlu1 %491  ;;  %v429_v18 = vsel %vm428_vm11, %v425_v6, %v2109_v38  ;;  %v2428_v38 = vld [vmem:[#allocation12_spill] sm:$0xff] }
 0x1af   : > { %953 = vmatpush1.bf16.msra.mxu1 %v429_v18  ;;  %v493_v1 = vsel %vm482_vm14, %v2205_v53, %v492_v30 }
 0x1b0   : > { %1046 = vmatpush1.bf16.msra.mxu0 %v493_v1 }
 0x1b1   : > { %v747_v28 = vpop.permute.xlu0 %746  ;;  %1079 = vmatprep.subr.bf16.mxu0 %v1831_v4  ;;  %v2430_v4 = vld [vmem:[#allocation14_spill] sm:$0xff] }
 0x1b2   : > { %v443_v29 = vpop.permute.xlu1 %442  ;;  %v750_v44 = vsel %vm446_vm12, %v747_v28, %v2120_v47 }
 0x1b3   : > { %v447_v26 = vsel %vm446_vm12, %v443_v29, %v2131_v56  ;;  %954 = vmatprep.subr.bf16.mxu1 %v750_v44  ;;  %1048 = vmatmul.mubr.bf16.vlgmr.msra.gmra.mrb[0].mxu0 %v1383_v49  ;;  %v2431_v56 = vld [vmem:[#allocation15_spill] sm:$0xff] }
 0x1b4   : > { %955 = vmatpush1.bf16.msra.mxu1 %v447_v26  ;;  %1080 = vmatpush1.bf16.msra.mxu0 %v2428_v38 }
 0x1b5   : > { %v550_v33 = vpop.permute.xlu0 %549  ;;  %1111 = vmatprep.mubr.bf16.mxu0 %v1541_v52 }
 0x1b6   : > { %v764_v53 = vpop.permute.xlu1 %763  ;;  %v551_v7 = vsel %vm215_vm0, %v2429_v8, %v550_v33 }
 0x1b7   : > { %v767_v36 = vsel %vm464_vm13, %v764_v53, %v2430_v4  ;;  %1081 = vmatprep.subr.bf16.mxu0 %v551_v7 }
 0x1b8   : > { %956 = vmatprep.subr.bf16.mxu1 %v767_v36 }
 0x1b9   : > { %v235_v47 = vpop.permute.xlu0 %234 }
 0x1ba   : > { %v461_v55 = vpop.permute.xlu1 %460  ;;  %v236_v31 = vsel %vm215_vm0, %v2431_v56, %v235_v47 }
 0x1bb   : > { %v465_v39 = vsel %vm464_vm13, %v461_v55, %v2432_v14  ;;  %1082 = vmatpush1.bf16.msra.mxu0 %v236_v31 }
 0x1bc   : > { %957 = vmatpush1.bf16.msra.mxu1 %v465_v39 }
 0x1bd   : > { %v572_v58 = vpop.permute.xlu0 %571 }
 0x1be   : > { %v781_v5 = vpop.permute.xlu1 %780  ;;  %v573_v42 = vsel %vm243_vm1, %v2433_v13, %v572_v58 }
 0x1bf   : > { %v784_v34 = vsel %vm482_vm14, %v781_v5, %v2434_v61  ;;  %1083 = vmatprep.subr.bf16.mxu0 %v573_v42 }
 0x1c0   : > { %958 = vmatprep.subr.bf16.mxu1 %v784_v34 }
 0x1c1   : > { %v258_v10 = vpop.permute.xlu0 %257 }
 0x1c2   : > { %v479_v45 = vpop.permute.xlu1 %478  ;;  %v259_v19 = vsel %vm243_vm1, %v2435_v0, %v258_v10 }
 0x1c3   : > { %v483_v3 = vsel %vm482_vm14, %v479_v45, %v2436_v48  ;;  %1084 = vmatpush1.bf16.msra.mxu0 %v259_v19 }
 0x1c4   : > { %959 = vmatpush1.bf16.msra.mxu1 %v483_v3 }
 0x1c6   : > { %1262 = vmatmul.mubr.msk.bf16.vlgmr.msra.gmra.mrb[0].mxu0 %vm392_vm9, %v1389_v16 }
 0x1c7   : > { %961 = vmatmul.mubr.bf16.vlgmr.msra.gmra.mrb[0].mxu1 %v1386_v37 }
 0x299   : > { %v1113_v21 = vpop.f32.mrb[0].mxu0 }
 0x29a   : > { %v962_v51 = vpop.f32.mrb[0].mxu1  ;;  %v1115_v12 = vpop.f32.mrb[1].mxu0 }
 0x29b   : > { %v1273_v15 = vadd.f32 %v1113_v21, %v962_v51  ;;  %v964_v20 = vpop.f32.mrb[1].mxu1  ;;  %v1117_v54 = vpop.f32.mrb[2].mxu0 }
 0x29c   : > { %v1274_v22 = vadd.f32 %v1115_v12, %v964_v20  ;;  %v966_v40 = vpop.f32.mrb[2].mxu1  ;;  %v1119_v25 = vpop.f32.mrb[3].mxu0 }
 0x29d   : > { %1126 = vst [vmem:[%s177_s30] sm:$0xff] %v1273_v15  ;;  %v1275_v57 = vadd.f32 %v1117_v54, %v966_v40  ;;  %v968_v32 = vpop.f32.mrb[3].mxu1 }
 0x29e   : > { %1263 = vst [vmem:[%s177_s30 + $0x10] sm:$0xff] %v1274_v22  ;;  %v1276_v62 = vadd.f32 %v1119_v25, %v968_v32 }
 0x29f   : > { %1127 = vst [vmem:[%s177_s30 + $0x8] sm:$0xff] %v1275_v57 }
 0x2a0   : > { %1264 = vst [vmem:[%s177_s30 + $0x18] sm:$0xff] %v1276_v62 }
 0x2a1   : > { %1461 = shalt.err (!%p1458_p7)
}
 0x2a2   : > { %s1462_s6 = scalar_lea.hbm %s2348_s19, 512  ;;  %s1466_s24 = scalar_lea.hbm %s2395_s2, 1024 }
 0x2a3   : > { %p1463_p9 = scmp.ne.s32.totalorder %s2348_s19, %s1462_s6  ;;  %p1467_p5 = scmp.lt.u32.totalorder %s2348_s19, %s2395_s2 }
 0x2a4   : > { %p1468_p11 = scmp.lt.u32.totalorder %s1466_s24, %s1462_s6  ;;  %p1470_p4 = scmp.lt.u32.totalorder %s1462_s6, %s2348_s19 }
 0x2a5   : > { %p1464_p2 = pnand %p1463_p9, %p1650_p12 }
 0x2a6   : > { %p1469_p1 = por %p1468_p11, %p1467_p5 }
 0x2a7   : > { %p1465_p0 = pneg %p1464_p2 }
 0x2a8   : > { %p1471_p6 = por %p1470_p4, %p1469_p1 }
 0x2aa   : > { %p1472_p8 = pnand %p1471_p6, %p1465_p0 }
 0x2ac   : > { %1475 = shalt.err (!%p1472_p8)
}
 0x2ad   : > { %s1543_s29 = smov 128  }
 0x2ae   : > { %1294 = dma.vmem_to_hbm [thread:$0]  (%p1650_p12), %s2343_s3, 512, %s2348_s19, %s1132_s13, %s1543_s29, %s1543_s29, %s1540_s26  }
 0x2af PF: > { %s1161_s30 = sand.u32 1, %s1506_s9   ;;  %p2437_p10 = scmp.ne.s32.totalorder %s2409_s16, 0 }
 0x2b0   : > { %p2438_p13 = scmp.ge.s32.totalorder %s1518_s12, 2  ;;  %s1162_s17 = scalar_lea.sflag [#allocation5], %s1161_s30 }
 0x2b2   : > { %p1305_p3 = pnand %p2438_p13, %p2437_p10 }
 0x2b4   : > { %1501 = dma.done.wait (!%p1305_p3), %s1162_s17, 512  }
 0x2b5   : > { %1503 = vsyncadd (!%p1305_p3), %s1162_s17, 4294966784  ;;  %p16_p7 = scmp.ge.s32.totalorder %s1615_s21, 4   ;;  %s2439_s9 = smov %s1510_s10 }
 0x2b6   : > { %s2440_s10 = smov %s1514_s11  ;;  %s2441_s11 = smov %s1646_s8 }
 0x2b7   : > { %s2442_s12 = smov %s1615_s21  ;;  %18 = sbr.rel (!%p16_p7) target bundleno = 6 (0x6), region = 79 }
 0x2be   :  { %1167 = vsyncpa [#allocation4], 1 }
 0x2bf   :  { %1169 = vsyncpa [#allocation4 + $0x1], 1 }
 0x2c0   :  { %1170 = vsyncpa [#allocation7], 1 }
 0x2c1   :  { %1171 = vsyncpa [#allocation5], 1 }
 0x2c2   :  { %1173 = vsyncpa [#allocation5 + $0x1], 1 }

</bundles_post_ra>
